<compile_context>
chip_gen: v6e
topology: v6e:2x2x1
jax: 0.10.0
libtpu: 0.0.40
codegen_flags: <defaults>
</compile_context>

<pallas_src>
import functools

import numpy as np

import jax
import jax.numpy as jnp
from jax import lax
from jax.experimental import pallas as pl
from jax.experimental.pallas import tpu as pltpu

BN_EPS = 1e-5
_TAPS = tuple((dh, dw) for dh in range(3) for dw in range(3))


def _round_up(x, m):
    return (x + m - 1) // m * m


# ----------------------------------------------------------------------------
# layout helpers (cheap one-pass XLA glue; replaces the old 9x HBM im2col)
# ----------------------------------------------------------------------------
def _flat_dims(H, W):
    Hp, Wp = H + 2, W + 2
    L0 = Hp * Wp
    G = Wp + 1                                # left guard inside the flat axis
    Ltot = _round_up(2 * G + L0, 128)         # lane-dense minor dim
    return Hp, Wp, L0, G, Ltot


def _to_flat_padded(x_nchw, G, Ltot):
    """(N,C,H,W) -> (N,C,Ltot): zero conv ring + flatten + guard pad."""
    N, C, H, W = x_nchw.shape
    xp = jnp.pad(x_nchw, ((0, 0), (0, 0), (1, 1), (1, 1)))
    flat = xp.reshape(N, C, (H + 2) * (W + 2))
    return jnp.pad(flat, ((0, 0), (0, 0), (G, Ltot - flat.shape[-1] - G)))


def _interior_mask(H, W, G, Ltot):
    """(1, Ltot) f32 mask of the real (non-ring / non-guard) pixels."""
    Hp, Wp = H + 2, W + 2
    q = np.arange(Ltot)
    p = q - G
    h = p // Wp
    w = p - h * Wp
    valid = ((p >= 0) & (p < Hp * Wp) &
             (h >= 1) & (h <= Hp - 2) & (w >= 1) & (w <= Wp - 2))
    return jnp.asarray(valid.astype(np.float32).reshape(1, Ltot))


# ----------------------------------------------------------------------------
# Fused [BN+ReLU of the previous layer] -> Conv3x3 (+bias), also accumulating
# this layer's BatchNorm batch statistics (sum, sum of squares) per channel.
# ----------------------------------------------------------------------------
def _conv_bn_stat_kernel(mask_ref, x_ref, w_ref, b_ref, sc_ref, sh_ref,
                         y_ref, s_ref, ss_ref, a_scr,
                         *, cin, cout, wp, ltot, guard, apply_act):
    @pl.when(pl.program_id(0) == 0)
    def _init():
        a_scr[...] = jnp.zeros_like(a_scr)        # zero the shift guards once
        s_ref[...] = jnp.zeros_like(s_ref)        # init the stat accumulators
        ss_ref[...] = jnp.zeros_like(ss_ref)

    mask = mask_ref[...]                          # (1, Ltot)
    a = x_ref[0]                                  # (Cin, Ltot) raw pre-BN input
    if apply_act:                                 # fused BN+ReLU of the previous layer
        a = jnp.maximum(a * sc_ref[...] + sh_ref[...], 0.0)
    # mask restores the conv zero-padding ring (and zeroes the guards)
    a_scr[:, guard:guard + ltot] = a * mask

    acc = jnp.zeros((cout, ltot), jnp.float32)
    for t, (dh, dw) in enumerate(_TAPS):          # 9 shifted VPU multiply-accumulates
        off = (dh - 1) * wp + (dw - 1)
        a_t = a_scr[:, guard + off:guard + off + ltot]   # (Cin, Ltot) shifted view
        for c in range(cin):
            acc = acc + w_ref[t, c] * a_t[c:c + 1, :]    # (Cout,1) * (1,Ltot)

    y = (acc + b_ref[...]) * mask                 # pre-BN conv output, 0 off-image
    y_ref[0] = y                                  # lane-dense (Cout, 384) store

    s_ref[...] += jnp.sum(y, axis=1, keepdims=True)        # batch-stat partials
    ss_ref[...] += jnp.sum(y * y, axis=1, keepdims=True)


def conv_bn_layer(x_flat, mask, w_hwio, bias, in_scale, in_shift,
                  *, H, W, apply_act):
    """x_flat: (N, Cin, Ltot) raw (pre-BN) activations of the previous layer
    (or the network input).  Returns (y (N,Cout,Ltot), sum (Cout,1), sumsq (Cout,1))."""
    N, Cin, Ltot = x_flat.shape
    Cout = w_hwio.shape[-1]
    Wp = W + 2
    guard = _round_up(Wp + 1, 128)                 # aligned shift guard in scratch
    wk = w_hwio.reshape(9, Cin, Cout)[..., None]   # (9, Cin, Cout, 1)

    kernel = functools.partial(
        _conv_bn_stat_kernel, cin=Cin, cout=Cout, wp=Wp, ltot=Ltot,
        guard=guard, apply_act=apply_act)

    flops = 2 * 9 * Cin * Cout * N * H * W
    bytes_accessed = 4 * (N * Cin * Ltot + N * Cout * Ltot
                          + 9 * Cin * Cout + 4 * Cout + Ltot)

    y, s, ss = pl.pallas_call(
        kernel,
        out_shape=(jax.ShapeDtypeStruct((N, Cout, Ltot), jnp.float32),
                   jax.ShapeDtypeStruct((Cout, 1), jnp.float32),
                   jax.ShapeDtypeStruct((Cout, 1), jnp.float32)),
        grid=(N,),
        in_specs=[
            pl.BlockSpec((1, Ltot), lambda n: (0, 0)),                # interior mask (resident)
            pl.BlockSpec((1, Cin, Ltot), lambda n: (n, 0, 0)),        # one image per step
            pl.BlockSpec((9, Cin, Cout, 1), lambda n: (0, 0, 0, 0)),  # weights (resident)
            pl.BlockSpec((Cout, 1), lambda n: (0, 0)),                # conv bias
            pl.BlockSpec((Cin, 1), lambda n: (0, 0)),                 # folded BN scale (prev layer)
            pl.BlockSpec((Cin, 1), lambda n: (0, 0)),                 # folded BN shift (prev layer)
        ],
        out_specs=(pl.BlockSpec((1, Cout, Ltot), lambda n: (n, 0, 0)),
                   pl.BlockSpec((Cout, 1), lambda n: (0, 0)),         # revisited accumulators
                   pl.BlockSpec((Cout, 1), lambda n: (0, 0))),
        scratch_shapes=[pltpu.VMEM((Cin, Ltot + 2 * guard), jnp.float32)],
        compiler_params=pltpu.CompilerParams(
            # the stat accumulators are revisited across the batch axis -> "arbitrary"
            dimension_semantics=("arbitrary",),
            vmem_limit_bytes=32 * 1024 * 1024),
        cost_estimate=pl.CostEstimate(flops=flops, transcendentals=0,
                                      bytes_accessed=bytes_accessed),
    )(mask, x_flat, wk, bias.reshape(Cout, 1),
      in_scale.reshape(Cin, 1), in_shift.reshape(Cin, 1))
    return y, s, ss


def _bn_fold(s, ss, gamma, beta, count):
    """Fold training-mode BatchNorm into a per-channel scale/shift."""
    mean = s[:, 0] / count
    var = ss[:, 0] / count - mean * mean          # biased batch variance (torch training mode)
    scale = gamma * lax.rsqrt(var + BN_EPS)
    shift = beta - mean * scale
    return scale, shift


# ----------------------------------------------------------------------------
# Fused BN+ReLU (of conv3) + MaxPool2d(2,2,return_indices=True).
# Indices follow PyTorch: flat h*W + w within each (n,c) plane, first
# occurrence wins on ties.
# ----------------------------------------------------------------------------
def _maxpool_bn_relu_kernel(c_ref, sc_ref, sh_ref, v_ref, i_ref, *, W):
    sc = sc_ref[...]                              # (C, 1, 1)
    sh = sh_ref[...]

    def act(v):
        return jnp.maximum(v * sc + sh, 0.0)

    a00 = act(c_ref[0, 0, 0])                     # (C, Ho, Wo): rows 2i,   cols 2j
    a01 = act(c_ref[0, 0, 1])                     #              rows 2i,   cols 2j+1
    a10 = act(c_ref[0, 1, 0])                     #              rows 2i+1, cols 2j
    a11 = act(c_ref[0, 1, 1])                     #              rows 2i+1, cols 2j+1

    shape = a00.shape
    oi = lax.broadcasted_iota(jnp.int32, shape, 1)
    oj = lax.broadcasted_iota(jnp.int32, shape, 2)
    i00 = (2 * oi) * W + 2 * oj                   # in-kernel index math, no HBM base array
    i01 = i00 + 1
    i10 = i00 + W
    i11 = i00 + W + 1

    top = a00 >= a01
    m_ab = jnp.where(top, a00, a01)
    i_ab = jnp.where(top, i00, i01)
    bot = a10 >= a11
    m_cd = jnp.where(bot, a10, a11)
    i_cd = jnp.where(bot, i10, i11)
    sel = m_ab >= m_cd
    v_ref[0] = jnp.where(sel, m_ab, m_cd)
    i_ref[0] = jnp.where(sel, i_ab, i_cd)


def maxpool2x2_bn_relu(cand, scale, shift, *, W):
    N, _, _, C, Ho, Wo = cand.shape
    # NOTE: at this toy size the pooled minor dim (Wo=8) is < 128 lanes; at
    # realistic image sizes Wo is a multiple of 128 and the stores are dense.
    return pl.pallas_call(
        functools.partial(_maxpool_bn_relu_kernel, W=W),
        out_shape=(jax.ShapeDtypeStruct((N, C, Ho, Wo), jnp.float32),
                   jax.ShapeDtypeStruct((N, C, Ho, Wo), jnp.int32)),
        grid=(N,),
        in_specs=[
            pl.BlockSpec((1, 2, 2, C, Ho, Wo), lambda n: (n, 0, 0, 0, 0, 0)),
            pl.BlockSpec((C, 1, 1), lambda n: (0, 0, 0)),
            pl.BlockSpec((C, 1, 1), lambda n: (0, 0, 0)),
        ],
        out_specs=(pl.BlockSpec((1, C, Ho, Wo), lambda n: (n, 0, 0, 0)),
                   pl.BlockSpec((1, C, Ho, Wo), lambda n: (n, 0, 0, 0))),
        compiler_params=pltpu.CompilerParams(
            dimension_semantics=("parallel",),     # batch axis can shard across TCs
            vmem_limit_bytes=32 * 1024 * 1024),
    )(cand, scale.reshape(C, 1, 1), shift.reshape(C, 1, 1))


# ----------------------------------------------------------------------------
# encoder2: params + forward
# ----------------------------------------------------------------------------
def init_params(key, in_size, out_size):
    params = []
    cin = in_size
    keys = jax.random.split(key, 6)
    for i in range(3):
        w = 0.1 * jax.random.normal(keys[2 * i], (3, 3, cin, out_size), jnp.float32)
        b = 0.1 * jax.random.normal(keys[2 * i + 1], (out_size,), jnp.float32)
        gamma = jnp.ones((out_size,), jnp.float32)   # BatchNorm2d default init
        beta = jnp.zeros((out_size,), jnp.float32)
        params.append((w, b, gamma, beta))
        cin = out_size
    return params


def encoder2_forward(params, x_nchw):
    N, C0, H, W = x_nchw.shape
    Hp, Wp, L0, G, Ltot = _flat_dims(H, W)
    mask = _interior_mask(H, W, G, Ltot)
    cur = _to_flat_padded(x_nchw, G, Ltot)        # (N, C0, Ltot)

    scale = jnp.ones((C0,), jnp.float32)          # identity "activation" for layer 1
    shift = jnp.zeros((C0,), jnp.float32)
    count = float(N * H * W)

    for li, (w, b, gamma, beta) in enumerate(params):
        cur, s, ss = conv_bn_layer(cur, mask, w, b, scale, shift,
                                   H=H, W=W, apply_act=(li > 0))
        scale, shift = _bn_fold(s, ss, gamma, beta, count)   # folded BN of *this* layer

    C = cur.shape[1]
    Ho, Wo = H // 2, W // 2
    unpooled_shape = (N, C, H, W)                 # == torch x.size() before pooling

    # glue: crop the guard/ring and split the 2x2 parities once (pure layout)
    y_img = cur[:, :, G:G + L0].reshape(N, C, Hp, Wp)[:, :, 1:1 + H, 1:1 + W]
    cand = jnp.transpose(y_img.reshape(N, C, Ho, 2, Wo, 2), (0, 3, 5, 1, 2, 4))

    pooled, ind = maxpool2x2_bn_relu(cand, scale, shift, W=W)
    # TODO(synk): torch returns int64 indices; int32 emitted here.
    return pooled, ind, unpooled_shape


# ----------------------------------------------------------------------------
# Pure-JAX reference (sanity check only)
# ----------------------------------------------------------------------------
def reference_forward(params, x_nchw):
    x = jnp.transpose(x_nchw, (0, 2, 3, 1))
    for (w, b, g, bt) in params:
        y = lax.conv_general_dilated(
            x, w, window_strides=(1, 1), padding="SAME",
            dimension_numbers=("NHWC", "HWIO", "NHWC"),
            precision=lax.Precision.HIGHEST)
        y = y + b
        mean = jnp.mean(y, axis=(0, 1, 2), keepdims=True)
        var = jnp.mean((y - mean) ** 2, axis=(0, 1, 2), keepdims=True)
        y = (y - mean) * lax.rsqrt(var + BN_EPS)
        x = jnp.maximum(y * g + bt, 0.0)
    N, H, W, C = x.shape
    v = x.reshape(N, H // 2, 2, W // 2, 2, C).max(axis=(2, 4))
    pre_nchw = jnp.transpose(x, (0, 3, 1, 2))
    return jnp.transpose(v, (0, 3, 1, 2)), pre_nchw


if __name__ == "__main__":
    key = jax.random.PRNGKey(0)
    pkey, xkey = jax.random.split(key)

    in_size, out_size = 4, 8
    N, H, W = 2, 16, 16
    params = init_params(pkey, in_size, out_size)
    x = jax.random.normal(xkey, (N, in_size, H, W), jnp.float32)

    pooled, ind, unpooled_shape = encoder2_forward(params, x)
    jax.block_until_ready(pooled)
    jax.block_until_ready(ind)

    # shape / dtype checks
    assert pooled.shape == (N, out_size, H // 2, W // 2)
    assert ind.shape == (N, out_size, H // 2, W // 2)
    assert unpooled_shape == (N, out_size, H, W)
    assert ind.dtype == jnp.int32

    # numeric check vs pure-JAX reference
    ref_pooled, ref_pre = reference_forward(params, x)
    assert jnp.allclose(pooled, ref_pooled, atol=1e-4, rtol=1e-4)

    # index consistency: gathering the pre-pool feature map at `ind`
    # reproduces the pooled values (PyTorch convention: h*W + w per plane)
    gathered = jnp.take_along_axis(
        ref_pre.reshape(N, out_size, H * W),
        ind.reshape(N, out_size, -1), axis=2).reshape(pooled.shape)
    assert jnp.allclose(gathered, pooled, atol=1e-4, rtol=1e-4)

    print("KERNEL_OK")
</pallas_src>

<mosaic_0001>
module attributes {stable_mosaic.version = 11 : i64} {
  func.func @_conv_bn_stat_kernel(%arg0: i32, %arg1: memref<1x384xf32, #tpu.memory_space<vmem>>, %arg2: memref<1x4x384xf32, #tpu.memory_space<vmem>>, %arg3: memref<9x4x8x1xf32, #tpu.memory_space<vmem>>, %arg4: memref<8x1xf32, #tpu.memory_space<vmem>>, %arg5: memref<4x1xf32, #tpu.memory_space<vmem>>, %arg6: memref<4x1xf32, #tpu.memory_space<vmem>>, %arg7: memref<1x8x384xf32, #tpu.memory_space<vmem>>, %arg8: memref<8x1xf32, #tpu.memory_space<vmem>>, %arg9: memref<8x1xf32, #tpu.memory_space<vmem>>, %arg10: memref<4x640xf32, #tpu.memory_space<vmem>>) attributes {dimension_semantics = [#tpu.dimension_semantics<arbitrary>], iteration_bounds = array<i64: 2>, scalar_prefetch = 0 : i64, scratch_operands = 1 : i64, tpu.core_type = #tpu.core_type<tc>, window_params = [{pipeline_mode = #tpu.pipeline_mode<synchronous>, transform_indices = @transform_0, window_bounds = array<i64: 1, 384>}, {transform_indices = @transform_1, window_bounds = array<i64: 1, 4, 384>}, {pipeline_mode = #tpu.pipeline_mode<synchronous>, transform_indices = @transform_2, window_bounds = array<i64: 9, 4, 8, 1>}, {pipeline_mode = #tpu.pipeline_mode<synchronous>, transform_indices = @transform_3, window_bounds = array<i64: 8, 1>}, {pipeline_mode = #tpu.pipeline_mode<synchronous>, transform_indices = @transform_4, window_bounds = array<i64: 4, 1>}, {pipeline_mode = #tpu.pipeline_mode<synchronous>, transform_indices = @transform_5, window_bounds = array<i64: 4, 1>}, {transform_indices = @transform_6, window_bounds = array<i64: 1, 8, 384>}, {pipeline_mode = #tpu.pipeline_mode<synchronous>, transform_indices = @transform_7, window_bounds = array<i64: 8, 1>}, {pipeline_mode = #tpu.pipeline_mode<synchronous>, transform_indices = @transform_8, window_bounds = array<i64: 8, 1>}]} {
    %c0_i32 = arith.constant 0 : i32
    %0 = arith.cmpi eq, %arg0, %c0_i32 : i32
    %1 = arith.extui %0 : i1 to i32
    %c0_i32_0 = arith.constant 0 : i32
    %2 = arith.cmpi ne, %1, %c0_i32_0 : i32
    scf.if %2 {
      %cst_167 = arith.constant 0.000000e+00 : f32
      %290 = vector.broadcast %cst_167 : f32 to vector<4x640xf32>
      %c0_168 = arith.constant 0 : index
      %c0_169 = arith.constant 0 : index
      %291 = vector.load %arg10[%c0_168, %c0_169] : memref<4x640xf32, #tpu.memory_space<vmem>>, vector<4x640xf32>
      tpu.vector_store %arg10[%c0_168, %c0_169], %290 {strides = array<i32>} : memref<4x640xf32, #tpu.memory_space<vmem>>, vector<4x640xf32>,
      %cst_170 = arith.constant 0.000000e+00 : f32
      %292 = vector.broadcast %cst_170 : f32 to vector<8x1xf32>
      %c0_171 = arith.constant 0 : index
      %c0_172 = arith.constant 0 : index
      %293 = vector.load %arg8[%c0_171, %c0_172] : memref<8x1xf32, #tpu.memory_space<vmem>>, vector<8x1xf32>
      tpu.vector_store %arg8[%c0_171, %c0_172], %292 {strides = array<i32>} : memref<8x1xf32, #tpu.memory_space<vmem>>, vector<8x1xf32>,
      %cst_173 = arith.constant 0.000000e+00 : f32
      %294 = vector.broadcast %cst_173 : f32 to vector<8x1xf32>
      %c0_174 = arith.constant 0 : index
      %c0_175 = arith.constant 0 : index
      %295 = vector.load %arg9[%c0_174, %c0_175] : memref<8x1xf32, #tpu.memory_space<vmem>>, vector<8x1xf32>
      tpu.vector_store %arg9[%c0_174, %c0_175], %294 {strides = array<i32>} : memref<8x1xf32, #tpu.memory_space<vmem>>, vector<8x1xf32>,
    } else {
    }
    %c0 = arith.constant 0 : index
    %c0_1 = arith.constant 0 : index
    %3 = vector.load %arg1[%c0, %c0_1] : memref<1x384xf32, #tpu.memory_space<vmem>>, vector<1x384xf32>
    %c0_2 = arith.constant 0 : index
    %c0_3 = arith.constant 0 : index
    %c0_4 = arith.constant 0 : index
    %4 = vector.load %arg2[%c0_2, %c0_3, %c0_4] : memref<1x4x384xf32, #tpu.memory_space<vmem>>, vector<1x4x384xf32>
    %5 = vector.shape_cast %4 : vector<1x4x384xf32> to vector<4x384xf32>
    %6 = vector.broadcast %3 : vector<1x384xf32> to vector<4x384xf32>
    %7 = arith.mulf %5, %6 : vector<4x384xf32>
    %c0_5 = arith.constant 0 : index
    %c128 = arith.constant 128 : index
    %8 = vector.load %arg10[%c0_5, %c128] : memref<4x640xf32, #tpu.memory_space<vmem>>, vector<4x384xf32>
    tpu.vector_store %arg10[%c0_5, %c128], %7 {strides = array<i32>} : memref<4x640xf32, #tpu.memory_space<vmem>>, vector<4x384xf32>,
    %cst = arith.constant 0.000000e+00 : f32
    %9 = vector.broadcast %cst : f32 to vector<8x384xf32>
    %c0_6 = arith.constant 0 : index
    %c109 = arith.constant 109 : index
    %10 = vector.load %arg10[%c0_6, %c109] : memref<4x640xf32, #tpu.memory_space<vmem>>, vector<4x384xf32>
    %c0_7 = arith.constant 0 : index
    %c0_8 = arith.constant 0 : index
    %c0_9 = arith.constant 0 : index
    %c0_10 = arith.constant 0 : index
    %11 = vector.load %arg3[%c0_7, %c0_8, %c0_9, %c0_10] : memref<9x4x8x1xf32, #tpu.memory_space<vmem>>, vector<1x1x8x1xf32>
    %12 = vector.shape_cast %11 : vector<1x1x8x1xf32> to vector<8x1xf32>
    %13 = vector.extract_strided_slice %10 {offsets = [0, 0], sizes = [1, 384], strides = [1, 1]} : vector<4x384xf32> to vector<1x384xf32>
    %14 = vector.broadcast %12 : vector<8x1xf32> to vector<8x384xf32>
    %15 = vector.broadcast %13 : vector<1x384xf32> to vector<8x384xf32>
    %16 = arith.mulf %14, %15 : vector<8x384xf32>
    %17 = arith.addf %9, %16 : vector<8x384xf32>
    %c0_11 = arith.constant 0 : index
    %c1 = arith.constant 1 : index
    %c0_12 = arith.constant 0 : index
    %c0_13 = arith.constant 0 : index
    %18 = vector.load %arg3[%c0_11, %c1, %c0_12, %c0_13] : memref<9x4x8x1xf32, #tpu.memory_space<vmem>>, vector<1x1x8x1xf32>
    %19 = vector.shape_cast %18 : vector<1x1x8x1xf32> to vector<8x1xf32>
    %20 = vector.extract_strided_slice %10 {offsets = [1, 0], sizes = [1, 384], strides = [1, 1]} : vector<4x384xf32> to vector<1x384xf32>
    %21 = vector.broadcast %19 : vector<8x1xf32> to vector<8x384xf32>
    %22 = vector.broadcast %20 : vector<1x384xf32> to vector<8x384xf32>
    %23 = arith.mulf %21, %22 : vector<8x384xf32>
    %24 = arith.addf %17, %23 : vector<8x384xf32>
    %c0_14 = arith.constant 0 : index
    %c2 = arith.constant 2 : index
    %c0_15 = arith.constant 0 : index
    %c0_16 = arith.constant 0 : index
    %25 = vector.load %arg3[%c0_14, %c2, %c0_15, %c0_16] : memref<9x4x8x1xf32, #tpu.memory_space<vmem>>, vector<1x1x8x1xf32>
    %26 = vector.shape_cast %25 : vector<1x1x8x1xf32> to vector<8x1xf32>
    %27 = vector.extract_strided_slice %10 {offsets = [2, 0], sizes = [1, 384], strides = [1, 1]} : vector<4x384xf32> to vector<1x384xf32>
    %28 = vector.broadcast %26 : vector<8x1xf32> to vector<8x384xf32>
    %29 = vector.broadcast %27 : vector<1x384xf32> to vector<8x384xf32>
    %30 = arith.mulf %28, %29 : vector<8x384xf32>
    %31 = arith.addf %24, %30 : vector<8x384xf32>
    %c0_17 = arith.constant 0 : index
    %c3 = arith.constant 3 : index
    %c0_18 = arith.constant 0 : index
    %c0_19 = arith.constant 0 : index
    %32 = vector.load %arg3[%c0_17, %c3, %c0_18, %c0_19] : memref<9x4x8x1xf32, #tpu.memory_space<vmem>>, vector<1x1x8x1xf32>
    %33 = vector.shape_cast %32 : vector<1x1x8x1xf32> to vector<8x1xf32>
    %34 = vector.extract_strided_slice %10 {offsets = [3, 0], sizes = [1, 384], strides = [1, 1]} : vector<4x384xf32> to vector<1x384xf32>
    %35 = vector.broadcast %33 : vector<8x1xf32> to vector<8x384xf32>
    %36 = vector.broadcast %34 : vector<1x384xf32> to vector<8x384xf32>
    %37 = arith.mulf %35, %36 : vector<8x384xf32>
    %38 = arith.addf %31, %37 : vector<8x384xf32>
    %c0_20 = arith.constant 0 : index
    %c110 = arith.constant 110 : index
    %39 = vector.load %arg10[%c0_20, %c110] : memref<4x640xf32, #tpu.memory_space<vmem>>, vector<4x384xf32>
    %c1_21 = arith.constant 1 : index
    %c0_22 = arith.constant 0 : index
    %c0_23 = arith.constant 0 : index
    %c0_24 = arith.constant 0 : index
    %40 = vector.load %arg3[%c1_21, %c0_22, %c0_23, %c0_24] : memref<9x4x8x1xf32, #tpu.memory_space<vmem>>, vector<1x1x8x1xf32>
    %41 = vector.shape_cast %40 : vector<1x1x8x1xf32> to vector<8x1xf32>
    %42 = vector.extract_strided_slice %39 {offsets = [0, 0], sizes = [1, 384], strides = [1, 1]} : vector<4x384xf32> to vector<1x384xf32>
    %43 = vector.broadcast %41 : vector<8x1xf32> to vector<8x384xf32>
    %44 = vector.broadcast %42 : vector<1x384xf32> to vector<8x384xf32>
    %45 = arith.mulf %43, %44 : vector<8x384xf32>
    %46 = arith.addf %38, %45 : vector<8x384xf32>
    %c1_25 = arith.constant 1 : index
    %c1_26 = arith.constant 1 : index
    %c0_27 = arith.constant 0 : index
    %c0_28 = arith.constant 0 : index
    %47 = vector.load %arg3[%c1_25, %c1_26, %c0_27, %c0_28] : memref<9x4x8x1xf32, #tpu.memory_space<vmem>>, vector<1x1x8x1xf32>
    %48 = vector.shape_cast %47 : vector<1x1x8x1xf32> to vector<8x1xf32>
    %49 = vector.extract_strided_slice %39 {offsets = [1, 0], sizes = [1, 384], strides = [1, 1]} : vector<4x384xf32> to vector<1x384xf32>
    %50 = vector.broadcast %48 : vector<8x1xf32> to vector<8x384xf32>
    %51 = vector.broadcast %49 : vector<1x384xf32> to vector<8x384xf32>
    %52 = arith.mulf %50, %51 : vector<8x384xf32>
    %53 = arith.addf %46, %52 : vector<8x384xf32>
    %c1_29 = arith.constant 1 : index
    %c2_30 = arith.constant 2 : index
    %c0_31 = arith.constant 0 : index
    %c0_32 = arith.constant 0 : index
    %54 = vector.load %arg3[%c1_29, %c2_30, %c0_31, %c0_32] : memref<9x4x8x1xf32, #tpu.memory_space<vmem>>, vector<1x1x8x1xf32>
    %55 = vector.shape_cast %54 : vector<1x1x8x1xf32> to vector<8x1xf32>
    %56 = vector.extract_strided_slice %39 {offsets = [2, 0], sizes = [1, 384], strides = [1, 1]} : vector<4x384xf32> to vector<1x384xf32>
    %57 = vector.broadcast %55 : vector<8x1xf32> to vector<8x384xf32>
    %58 = vector.broadcast %56 : vector<1x384xf32> to vector<8x384xf32>
    %59 = arith.mulf %57, %58 : vector<8x384xf32>
    %60 = arith.addf %53, %59 : vector<8x384xf32>
    %c1_33 = arith.constant 1 : index
    %c3_34 = arith.constant 3 : index
    %c0_35 = arith.constant 0 : index
    %c0_36 = arith.constant 0 : index
    %61 = vector.load %arg3[%c1_33, %c3_34, %c0_35, %c0_36] : memref<9x4x8x1xf32, #tpu.memory_space<vmem>>, vector<1x1x8x1xf32>
    %62 = vector.shape_cast %61 : vector<1x1x8x1xf32> to vector<8x1xf32>
    %63 = vector.extract_strided_slice %39 {offsets = [3, 0], sizes = [1, 384], strides = [1, 1]} : vector<4x384xf32> to vector<1x384xf32>
    %64 = vector.broadcast %62 : vector<8x1xf32> to vector<8x384xf32>
    %65 = vector.broadcast %63 : vector<1x384xf32> to vector<8x384xf32>
    %66 = arith.mulf %64, %65 : vector<8x384xf32>
    %67 = arith.addf %60, %66 : vector<8x384xf32>
    %c0_37 = arith.constant 0 : index
    %c111 = arith.constant 111 : index
    %68 = vector.load %arg10[%c0_37, %c111] : memref<4x640xf32, #tpu.memory_space<vmem>>, vector<4x384xf32>
    %c2_38 = arith.constant 2 : index
    %c0_39 = arith.constant 0 : index
    %c0_40 = arith.constant 0 : index
    %c0_41 = arith.constant 0 : index
    %69 = vector.load %arg3[%c2_38, %c0_39, %c0_40, %c0_41] : memref<9x4x8x1xf32, #tpu.memory_space<vmem>>, vector<1x1x8x1xf32>
    %70 = vector.shape_cast %69 : vector<1x1x8x1xf32> to vector<8x1xf32>
    %71 = vector.extract_strided_slice %68 {offsets = [0, 0], sizes = [1, 384], strides = [1, 1]} : vector<4x384xf32> to vector<1x384xf32>
    %72 = vector.broadcast %70 : vector<8x1xf32> to vector<8x384xf32>
    %73 = vector.broadcast %71 : vector<1x384xf32> to vector<8x384xf32>
    %74 = arith.mulf %72, %73 : vector<8x384xf32>
    %75 = arith.addf %67, %74 : vector<8x384xf32>
    %c2_42 = arith.constant 2 : index
    %c1_43 = arith.constant 1 : index
    %c0_44 = arith.constant 0 : index
    %c0_45 = arith.constant 0 : index
    %76 = vector.load %arg3[%c2_42, %c1_43, %c0_44, %c0_45] : memref<9x4x8x1xf32, #tpu.memory_space<vmem>>, vector<1x1x8x1xf32>
    %77 = vector.shape_cast %76 : vector<1x1x8x1xf32> to vector<8x1xf32>
    %78 = vector.extract_strided_slice %68 {offsets = [1, 0], sizes = [1, 384], strides = [1, 1]} : vector<4x384xf32> to vector<1x384xf32>
    %79 = vector.broadcast %77 : vector<8x1xf32> to vector<8x384xf32>
    %80 = vector.broadcast %78 : vector<1x384xf32> to vector<8x384xf32>
    %81 = arith.mulf %79, %80 : vector<8x384xf32>
    %82 = arith.addf %75, %81 : vector<8x384xf32>
    %c2_46 = arith.constant 2 : index
    %c2_47 = arith.constant 2 : index
    %c0_48 = arith.constant 0 : index
    %c0_49 = arith.constant 0 : index
    %83 = vector.load %arg3[%c2_46, %c2_47, %c0_48, %c0_49] : memref<9x4x8x1xf32, #tpu.memory_space<vmem>>, vector<1x1x8x1xf32>
    %84 = vector.shape_cast %83 : vector<1x1x8x1xf32> to vector<8x1xf32>
    %85 = vector.extract_strided_slice %68 {offsets = [2, 0], sizes = [1, 384], strides = [1, 1]} : vector<4x384xf32> to vector<1x384xf32>
    %86 = vector.broadcast %84 : vector<8x1xf32> to vector<8x384xf32>
    %87 = vector.broadcast %85 : vector<1x384xf32> to vector<8x384xf32>
    %88 = arith.mulf %86, %87 : vector<8x384xf32>
    %89 = arith.addf %82, %88 : vector<8x384xf32>
    %c2_50 = arith.constant 2 : index
    %c3_51 = arith.constant 3 : index
    %c0_52 = arith.constant 0 : index
    %c0_53 = arith.constant 0 : index
    %90 = vector.load %arg3[%c2_50, %c3_51, %c0_52, %c0_53] : memref<9x4x8x1xf32, #tpu.memory_space<vmem>>, vector<1x1x8x1xf32>
    %91 = vector.shape_cast %90 : vector<1x1x8x1xf32> to vector<8x1xf32>
    %92 = vector.extract_strided_slice %68 {offsets = [3, 0], sizes = [1, 384], strides = [1, 1]} : vector<4x384xf32> to vector<1x384xf32>
    %93 = vector.broadcast %91 : vector<8x1xf32> to vector<8x384xf32>
    %94 = vector.broadcast %92 : vector<1x384xf32> to vector<8x384xf32>
    %95 = arith.mulf %93, %94 : vector<8x384xf32>
    %96 = arith.addf %89, %95 : vector<8x384xf32>
    %c0_54 = arith.constant 0 : index
    %c127 = arith.constant 127 : index
    %97 = vector.load %arg10[%c0_54, %c127] : memref<4x640xf32, #tpu.memory_space<vmem>>, vector<4x384xf32>
    %c3_55 = arith.constant 3 : index
    %c0_56 = arith.constant 0 : index
    %c0_57 = arith.constant 0 : index
    %c0_58 = arith.constant 0 : index
    %98 = vector.load %arg3[%c3_55, %c0_56, %c0_57, %c0_58] : memref<9x4x8x1xf32, #tpu.memory_space<vmem>>, vector<1x1x8x1xf32>
    %99 = vector.shape_cast %98 : vector<1x1x8x1xf32> to vector<8x1xf32>
    %100 = vector.extract_strided_slice %97 {offsets = [0, 0], sizes = [1, 384], strides = [1, 1]} : vector<4x384xf32> to vector<1x384xf32>
    %101 = vector.broadcast %99 : vector<8x1xf32> to vector<8x384xf32>
    %102 = vector.broadcast %100 : vector<1x384xf32> to vector<8x384xf32>
    %103 = arith.mulf %101, %102 : vector<8x384xf32>
    %104 = arith.addf %96, %103 : vector<8x384xf32>
    %c3_59 = arith.constant 3 : index
    %c1_60 = arith.constant 1 : index
    %c0_61 = arith.constant 0 : index
    %c0_62 = arith.constant 0 : index
    %105 = vector.load %arg3[%c3_59, %c1_60, %c0_61, %c0_62] : memref<9x4x8x1xf32, #tpu.memory_space<vmem>>, vector<1x1x8x1xf32>
    %106 = vector.shape_cast %105 : vector<1x1x8x1xf32> to vector<8x1xf32>
    %107 = vector.extract_strided_slice %97 {offsets = [1, 0], sizes = [1, 384], strides = [1, 1]} : vector<4x384xf32> to vector<1x384xf32>
    %108 = vector.broadcast %106 : vector<8x1xf32> to vector<8x384xf32>
    %109 = vector.broadcast %107 : vector<1x384xf32> to vector<8x384xf32>
    %110 = arith.mulf %108, %109 : vector<8x384xf32>
    %111 = arith.addf %104, %110 : vector<8x384xf32>
    %c3_63 = arith.constant 3 : index
    %c2_64 = arith.constant 2 : index
    %c0_65 = arith.constant 0 : index
    %c0_66 = arith.constant 0 : index
    %112 = vector.load %arg3[%c3_63, %c2_64, %c0_65, %c0_66] : memref<9x4x8x1xf32, #tpu.memory_space<vmem>>, vector<1x1x8x1xf32>
    %113 = vector.shape_cast %112 : vector<1x1x8x1xf32> to vector<8x1xf32>
    %114 = vector.extract_strided_slice %97 {offsets = [2, 0], sizes = [1, 384], strides = [1, 1]} : vector<4x384xf32> to vector<1x384xf32>
    %115 = vector.broadcast %113 : vector<8x1xf32> to vector<8x384xf32>
    %116 = vector.broadcast %114 : vector<1x384xf32> to vector<8x384xf32>
    %117 = arith.mulf %115, %116 : vector<8x384xf32>
    %118 = arith.addf %111, %117 : vector<8x384xf32>
    %c3_67 = arith.constant 3 : index
    %c3_68 = arith.constant 3 : index
    %c0_69 = arith.constant 0 : index
    %c0_70 = arith.constant 0 : index
    %119 = vector.load %arg3[%c3_67, %c3_68, %c0_69, %c0_70] : memref<9x4x8x1xf32, #tpu.memory_space<vmem>>, vector<1x1x8x1xf32>
    %120 = vector.shape_cast %119 : vector<1x1x8x1xf32> to vector<8x1xf32>
    %121 = vector.extract_strided_slice %97 {offsets = [3, 0], sizes = [1, 384], strides = [1, 1]} : vector<4x384xf32> to vector<1x384xf32>
    %122 = vector.broadcast %120 : vector<8x1xf32> to vector<8x384xf32>
    %123 = vector.broadcast %121 : vector<1x384xf32> to vector<8x384xf32>
    %124 = arith.mulf %122, %123 : vector<8x384xf32>
    %125 = arith.addf %118, %124 : vector<8x384xf32>
    %c0_71 = arith.constant 0 : index
    %c128_72 = arith.constant 128 : index
    %126 = vector.load %arg10[%c0_71, %c128_72] : memref<4x640xf32, #tpu.memory_space<vmem>>, vector<4x384xf32>
    %c4 = arith.constant 4 : index
    %c0_73 = arith.constant 0 : index
    %c0_74 = arith.constant 0 : index
    %c0_75 = arith.constant 0 : index
    %127 = vector.load %arg3[%c4, %c0_73, %c0_74, %c0_75] : memref<9x4x8x1xf32, #tpu.memory_space<vmem>>, vector<1x1x8x1xf32>
    %128 = vector.shape_cast %127 : vector<1x1x8x1xf32> to vector<8x1xf32>
    %129 = vector.extract_strided_slice %126 {offsets = [0, 0], sizes = [1, 384], strides = [1, 1]} : vector<4x384xf32> to vector<1x384xf32>
    %130 = vector.broadcast %128 : vector<8x1xf32> to vector<8x384xf32>
    %131 = vector.broadcast %129 : vector<1x384xf32> to vector<8x384xf32>
    %132 = arith.mulf %130, %131 : vector<8x384xf32>
    %133 = arith.addf %125, %132 : vector<8x384xf32>
    %c4_76 = arith.constant 4 : index
    %c1_77 = arith.constant 1 : index
    %c0_78 = arith.constant 0 : index
    %c0_79 = arith.constant 0 : index
    %134 = vector.load %arg3[%c4_76, %c1_77, %c0_78, %c0_79] : memref<9x4x8x1xf32, #tpu.memory_space<vmem>>, vector<1x1x8x1xf32>
    %135 = vector.shape_cast %134 : vector<1x1x8x1xf32> to vector<8x1xf32>
    %136 = vector.extract_strided_slice %126 {offsets = [1, 0], sizes = [1, 384], strides = [1, 1]} : vector<4x384xf32> to vector<1x384xf32>
    %137 = vector.broadcast %135 : vector<8x1xf32> to vector<8x384xf32>
    %138 = vector.broadcast %136 : vector<1x384xf32> to vector<8x384xf32>
    %139 = arith.mulf %137, %138 : vector<8x384xf32>
    %140 = arith.addf %133, %139 : vector<8x384xf32>
    %c4_80 = arith.constant 4 : index
    %c2_81 = arith.constant 2 : index
    %c0_82 = arith.constant 0 : index
    %c0_83 = arith.constant 0 : index
    %141 = vector.load %arg3[%c4_80, %c2_81, %c0_82, %c0_83] : memref<9x4x8x1xf32, #tpu.memory_space<vmem>>, vector<1x1x8x1xf32>
    %142 = vector.shape_cast %141 : vector<1x1x8x1xf32> to vector<8x1xf32>
    %143 = vector.extract_strided_slice %126 {offsets = [2, 0], sizes = [1, 384], strides = [1, 1]} : vector<4x384xf32> to vector<1x384xf32>
    %144 = vector.broadcast %142 : vector<8x1xf32> to vector<8x384xf32>
    %145 = vector.broadcast %143 : vector<1x384xf32> to vector<8x384xf32>
    %146 = arith.mulf %144, %145 : vector<8x384xf32>
    %147 = arith.addf %140, %146 : vector<8x384xf32>
    %c4_84 = arith.constant 4 : index
    %c3_85 = arith.constant 3 : index
    %c0_86 = arith.constant 0 : index
    %c0_87 = arith.constant 0 : index
    %148 = vector.load %arg3[%c4_84, %c3_85, %c0_86, %c0_87] : memref<9x4x8x1xf32, #tpu.memory_space<vmem>>, vector<1x1x8x1xf32>
    %149 = vector.shape_cast %148 : vector<1x1x8x1xf32> to vector<8x1xf32>
    %150 = vector.extract_strided_slice %126 {offsets = [3, 0], sizes = [1, 384], strides = [1, 1]} : vector<4x384xf32> to vector<1x384xf32>
    %151 = vector.broadcast %149 : vector<8x1xf32> to vector<8x384xf32>
    %152 = vector.broadcast %150 : vector<1x384xf32> to vector<8x384xf32>
    %153 = arith.mulf %151, %152 : vector<8x384xf32>
    %154 = arith.addf %147, %153 : vector<8x384xf32>
    %c0_88 = arith.constant 0 : index
    %c129 = arith.constant 129 : index
    %155 = vector.load %arg10[%c0_88, %c129] : memref<4x640xf32, #tpu.memory_space<vmem>>, vector<4x384xf32>
    %c5 = arith.constant 5 : index
    %c0_89 = arith.constant 0 : index
    %c0_90 = arith.constant 0 : index
    %c0_91 = arith.constant 0 : index
    %156 = vector.load %arg3[%c5, %c0_89, %c0_90, %c0_91] : memref<9x4x8x1xf32, #tpu.memory_space<vmem>>, vector<1x1x8x1xf32>
    %157 = vector.shape_cast %156 : vector<1x1x8x1xf32> to vector<8x1xf32>
    %158 = vector.extract_strided_slice %155 {offsets = [0, 0], sizes = [1, 384], strides = [1, 1]} : vector<4x384xf32> to vector<1x384xf32>
    %159 = vector.broadcast %157 : vector<8x1xf32> to vector<8x384xf32>
    %160 = vector.broadcast %158 : vector<1x384xf32> to vector<8x384xf32>
    %161 = arith.mulf %159, %160 : vector<8x384xf32>
    %162 = arith.addf %154, %161 : vector<8x384xf32>
    %c5_92 = arith.constant 5 : index
    %c1_93 = arith.constant 1 : index
    %c0_94 = arith.constant 0 : index
    %c0_95 = arith.constant 0 : index
    %163 = vector.load %arg3[%c5_92, %c1_93, %c0_94, %c0_95] : memref<9x4x8x1xf32, #tpu.memory_space<vmem>>, vector<1x1x8x1xf32>
    %164 = vector.shape_cast %163 : vector<1x1x8x1xf32> to vector<8x1xf32>
    %165 = vector.extract_strided_slice %155 {offsets = [1, 0], sizes = [1, 384], strides = [1, 1]} : vector<4x384xf32> to vector<1x384xf32>
    %166 = vector.broadcast %164 : vector<8x1xf32> to vector<8x384xf32>
    %167 = vector.broadcast %165 : vector<1x384xf32> to vector<8x384xf32>
    %168 = arith.mulf %166, %167 : vector<8x384xf32>
    %169 = arith.addf %162, %168 : vector<8x384xf32>
    %c5_96 = arith.constant 5 : index
    %c2_97 = arith.constant 2 : index
    %c0_98 = arith.constant 0 : index
    %c0_99 = arith.constant 0 : index
    %170 = vector.load %arg3[%c5_96, %c2_97, %c0_98, %c0_99] : memref<9x4x8x1xf32, #tpu.memory_space<vmem>>, vector<1x1x8x1xf32>
    %171 = vector.shape_cast %170 : vector<1x1x8x1xf32> to vector<8x1xf32>
    %172 = vector.extract_strided_slice %155 {offsets = [2, 0], sizes = [1, 384], strides = [1, 1]} : vector<4x384xf32> to vector<1x384xf32>
    %173 = vector.broadcast %171 : vector<8x1xf32> to vector<8x384xf32>
    %174 = vector.broadcast %172 : vector<1x384xf32> to vector<8x384xf32>
    %175 = arith.mulf %173, %174 : vector<8x384xf32>
    %176 = arith.addf %169, %175 : vector<8x384xf32>
    %c5_100 = arith.constant 5 : index
    %c3_101 = arith.constant 3 : index
    %c0_102 = arith.constant 0 : index
    %c0_103 = arith.constant 0 : index
    %177 = vector.load %arg3[%c5_100, %c3_101, %c0_102, %c0_103] : memref<9x4x8x1xf32, #tpu.memory_space<vmem>>, vector<1x1x8x1xf32>
    %178 = vector.shape_cast %177 : vector<1x1x8x1xf32> to vector<8x1xf32>
    %179 = vector.extract_strided_slice %155 {offsets = [3, 0], sizes = [1, 384], strides = [1, 1]} : vector<4x384xf32> to vector<1x384xf32>
    %180 = vector.broadcast %178 : vector<8x1xf32> to vector<8x384xf32>
    %181 = vector.broadcast %179 : vector<1x384xf32> to vector<8x384xf32>
    %182 = arith.mulf %180, %181 : vector<8x384xf32>
    %183 = arith.addf %176, %182 : vector<8x384xf32>
    %c0_104 = arith.constant 0 : index
    %c145 = arith.constant 145 : index
    %184 = vector.load %arg10[%c0_104, %c145] : memref<4x640xf32, #tpu.memory_space<vmem>>, vector<4x384xf32>
    %c6 = arith.constant 6 : index
    %c0_105 = arith.constant 0 : index
    %c0_106 = arith.constant 0 : index
    %c0_107 = arith.constant 0 : index
    %185 = vector.load %arg3[%c6, %c0_105, %c0_106, %c0_107] : memref<9x4x8x1xf32, #tpu.memory_space<vmem>>, vector<1x1x8x1xf32>
    %186 = vector.shape_cast %185 : vector<1x1x8x1xf32> to vector<8x1xf32>
    %187 = vector.extract_strided_slice %184 {offsets = [0, 0], sizes = [1, 384], strides = [1, 1]} : vector<4x384xf32> to vector<1x384xf32>
    %188 = vector.broadcast %186 : vector<8x1xf32> to vector<8x384xf32>
    %189 = vector.broadcast %187 : vector<1x384xf32> to vector<8x384xf32>
    %190 = arith.mulf %188, %189 : vector<8x384xf32>
    %191 = arith.addf %183, %190 : vector<8x384xf32>
    %c6_108 = arith.constant 6 : index
    %c1_109 = arith.constant 1 : index
    %c0_110 = arith.constant 0 : index
    %c0_111 = arith.constant 0 : index
    %192 = vector.load %arg3[%c6_108, %c1_109, %c0_110, %c0_111] : memref<9x4x8x1xf32, #tpu.memory_space<vmem>>, vector<1x1x8x1xf32>
    %193 = vector.shape_cast %192 : vector<1x1x8x1xf32> to vector<8x1xf32>
    %194 = vector.extract_strided_slice %184 {offsets = [1, 0], sizes = [1, 384], strides = [1, 1]} : vector<4x384xf32> to vector<1x384xf32>
    %195 = vector.broadcast %193 : vector<8x1xf32> to vector<8x384xf32>
    %196 = vector.broadcast %194 : vector<1x384xf32> to vector<8x384xf32>
    %197 = arith.mulf %195, %196 : vector<8x384xf32>
    %198 = arith.addf %191, %197 : vector<8x384xf32>
    %c6_112 = arith.constant 6 : index
    %c2_113 = arith.constant 2 : index
    %c0_114 = arith.constant 0 : index
    %c0_115 = arith.constant 0 : index
    %199 = vector.load %arg3[%c6_112, %c2_113, %c0_114, %c0_115] : memref<9x4x8x1xf32, #tpu.memory_space<vmem>>, vector<1x1x8x1xf32>
    %200 = vector.shape_cast %199 : vector<1x1x8x1xf32> to vector<8x1xf32>
    %201 = vector.extract_strided_slice %184 {offsets = [2, 0], sizes = [1, 384], strides = [1, 1]} : vector<4x384xf32> to vector<1x384xf32>
    %202 = vector.broadcast %200 : vector<8x1xf32> to vector<8x384xf32>
    %203 = vector.broadcast %201 : vector<1x384xf32> to vector<8x384xf32>
    %204 = arith.mulf %202, %203 : vector<8x384xf32>
    %205 = arith.addf %198, %204 : vector<8x384xf32>
    %c6_116 = arith.constant 6 : index
    %c3_117 = arith.constant 3 : index
    %c0_118 = arith.constant 0 : index
    %c0_119 = arith.constant 0 : index
    %206 = vector.load %arg3[%c6_116, %c3_117, %c0_118, %c0_119] : memref<9x4x8x1xf32, #tpu.memory_space<vmem>>, vector<1x1x8x1xf32>
    %207 = vector.shape_cast %206 : vector<1x1x8x1xf32> to vector<8x1xf32>
    %208 = vector.extract_strided_slice %184 {offsets = [3, 0], sizes = [1, 384], strides = [1, 1]} : vector<4x384xf32> to vector<1x384xf32>
    %209 = vector.broadcast %207 : vector<8x1xf32> to vector<8x384xf32>
    %210 = vector.broadcast %208 : vector<1x384xf32> to vector<8x384xf32>
    %211 = arith.mulf %209, %210 : vector<8x384xf32>
    %212 = arith.addf %205, %211 : vector<8x384xf32>
    %c0_120 = arith.constant 0 : index
    %c146 = arith.constant 146 : index
    %213 = vector.load %arg10[%c0_120, %c146] : memref<4x640xf32, #tpu.memory_space<vmem>>, vector<4x384xf32>
    %c7 = arith.constant 7 : index
    %c0_121 = arith.constant 0 : index
    %c0_122 = arith.constant 0 : index
    %c0_123 = arith.constant 0 : index
    %214 = vector.load %arg3[%c7, %c0_121, %c0_122, %c0_123] : memref<9x4x8x1xf32, #tpu.memory_space<vmem>>, vector<1x1x8x1xf32>
    %215 = vector.shape_cast %214 : vector<1x1x8x1xf32> to vector<8x1xf32>
    %216 = vector.extract_strided_slice %213 {offsets = [0, 0], sizes = [1, 384], strides = [1, 1]} : vector<4x384xf32> to vector<1x384xf32>
    %217 = vector.broadcast %215 : vector<8x1xf32> to vector<8x384xf32>
    %218 = vector.broadcast %216 : vector<1x384xf32> to vector<8x384xf32>
    %219 = arith.mulf %217, %218 : vector<8x384xf32>
    %220 = arith.addf %212, %219 : vector<8x384xf32>
    %c7_124 = arith.constant 7 : index
    %c1_125 = arith.constant 1 : index
    %c0_126 = arith.constant 0 : index
    %c0_127 = arith.constant 0 : index
    %221 = vector.load %arg3[%c7_124, %c1_125, %c0_126, %c0_127] : memref<9x4x8x1xf32, #tpu.memory_space<vmem>>, vector<1x1x8x1xf32>
    %222 = vector.shape_cast %221 : vector<1x1x8x1xf32> to vector<8x1xf32>
    %223 = vector.extract_strided_slice %213 {offsets = [1, 0], sizes = [1, 384], strides = [1, 1]} : vector<4x384xf32> to vector<1x384xf32>
    %224 = vector.broadcast %222 : vector<8x1xf32> to vector<8x384xf32>
    %225 = vector.broadcast %223 : vector<1x384xf32> to vector<8x384xf32>
    %226 = arith.mulf %224, %225 : vector<8x384xf32>
    %227 = arith.addf %220, %226 : vector<8x384xf32>
    %c7_128 = arith.constant 7 : index
    %c2_129 = arith.constant 2 : index
    %c0_130 = arith.constant 0 : index
    %c0_131 = arith.constant 0 : index
    %228 = vector.load %arg3[%c7_128, %c2_129, %c0_130, %c0_131] : memref<9x4x8x1xf32, #tpu.memory_space<vmem>>, vector<1x1x8x1xf32>
    %229 = vector.shape_cast %228 : vector<1x1x8x1xf32> to vector<8x1xf32>
    %230 = vector.extract_strided_slice %213 {offsets = [2, 0], sizes = [1, 384], strides = [1, 1]} : vector<4x384xf32> to vector<1x384xf32>
    %231 = vector.broadcast %229 : vector<8x1xf32> to vector<8x384xf32>
    %232 = vector.broadcast %230 : vector<1x384xf32> to vector<8x384xf32>
    %233 = arith.mulf %231, %232 : vector<8x384xf32>
    %234 = arith.addf %227, %233 : vector<8x384xf32>
    %c7_132 = arith.constant 7 : index
    %c3_133 = arith.constant 3 : index
    %c0_134 = arith.constant 0 : index
    %c0_135 = arith.constant 0 : index
    %235 = vector.load %arg3[%c7_132, %c3_133, %c0_134, %c0_135] : memref<9x4x8x1xf32, #tpu.memory_space<vmem>>, vector<1x1x8x1xf32>
    %236 = vector.shape_cast %235 : vector<1x1x8x1xf32> to vector<8x1xf32>
    %237 = vector.extract_strided_slice %213 {offsets = [3, 0], sizes = [1, 384], strides = [1, 1]} : vector<4x384xf32> to vector<1x384xf32>
    %238 = vector.broadcast %236 : vector<8x1xf32> to vector<8x384xf32>
    %239 = vector.broadcast %237 : vector<1x384xf32> to vector<8x384xf32>
    %240 = arith.mulf %238, %239 : vector<8x384xf32>
    %241 = arith.addf %234, %240 : vector<8x384xf32>
    %c0_136 = arith.constant 0 : index
    %c147 = arith.constant 147 : index
    %242 = vector.load %arg10[%c0_136, %c147] : memref<4x640xf32, #tpu.memory_space<vmem>>, vector<4x384xf32>
    %c8 = arith.constant 8 : index
    %c0_137 = arith.constant 0 : index
    %c0_138 = arith.constant 0 : index
    %c0_139 = arith.constant 0 : index
    %243 = vector.load %arg3[%c8, %c0_137, %c0_138, %c0_139] : memref<9x4x8x1xf32, #tpu.memory_space<vmem>>, vector<1x1x8x1xf32>
    %244 = vector.shape_cast %243 : vector<1x1x8x1xf32> to vector<8x1xf32>
    %245 = vector.extract_strided_slice %242 {offsets = [0, 0], sizes = [1, 384], strides = [1, 1]} : vector<4x384xf32> to vector<1x384xf32>
    %246 = vector.broadcast %244 : vector<8x1xf32> to vector<8x384xf32>
    %247 = vector.broadcast %245 : vector<1x384xf32> to vector<8x384xf32>
    %248 = arith.mulf %246, %247 : vector<8x384xf32>
    %249 = arith.addf %241, %248 : vector<8x384xf32>
    %c8_140 = arith.constant 8 : index
    %c1_141 = arith.constant 1 : index
    %c0_142 = arith.constant 0 : index
    %c0_143 = arith.constant 0 : index
    %250 = vector.load %arg3[%c8_140, %c1_141, %c0_142, %c0_143] : memref<9x4x8x1xf32, #tpu.memory_space<vmem>>, vector<1x1x8x1xf32>
    %251 = vector.shape_cast %250 : vector<1x1x8x1xf32> to vector<8x1xf32>
    %252 = vector.extract_strided_slice %242 {offsets = [1, 0], sizes = [1, 384], strides = [1, 1]} : vector<4x384xf32> to vector<1x384xf32>
    %253 = vector.broadcast %251 : vector<8x1xf32> to vector<8x384xf32>
    %254 = vector.broadcast %252 : vector<1x384xf32> to vector<8x384xf32>
    %255 = arith.mulf %253, %254 : vector<8x384xf32>
    %256 = arith.addf %249, %255 : vector<8x384xf32>
    %c8_144 = arith.constant 8 : index
    %c2_145 = arith.constant 2 : index
    %c0_146 = arith.constant 0 : index
    %c0_147 = arith.constant 0 : index
    %257 = vector.load %arg3[%c8_144, %c2_145, %c0_146, %c0_147] : memref<9x4x8x1xf32, #tpu.memory_space<vmem>>, vector<1x1x8x1xf32>
    %258 = vector.shape_cast %257 : vector<1x1x8x1xf32> to vector<8x1xf32>
    %259 = vector.extract_strided_slice %242 {offsets = [2, 0], sizes = [1, 384], strides = [1, 1]} : vector<4x384xf32> to vector<1x384xf32>
    %260 = vector.broadcast %258 : vector<8x1xf32> to vector<8x384xf32>
    %261 = vector.broadcast %259 : vector<1x384xf32> to vector<8x384xf32>
    %262 = arith.mulf %260, %261 : vector<8x384xf32>
    %263 = arith.addf %256, %262 : vector<8x384xf32>
    %c8_148 = arith.constant 8 : index
    %c3_149 = arith.constant 3 : index
    %c0_150 = arith.constant 0 : index
    %c0_151 = arith.constant 0 : index
    %264 = vector.load %arg3[%c8_148, %c3_149, %c0_150, %c0_151] : memref<9x4x8x1xf32, #tpu.memory_space<vmem>>, vector<1x1x8x1xf32>
    %265 = vector.shape_cast %264 : vector<1x1x8x1xf32> to vector<8x1xf32>
    %266 = vector.extract_strided_slice %242 {offsets = [3, 0], sizes = [1, 384], strides = [1, 1]} : vector<4x384xf32> to vector<1x384xf32>
    %267 = vector.broadcast %265 : vector<8x1xf32> to vector<8x384xf32>
    %268 = vector.broadcast %266 : vector<1x384xf32> to vector<8x384xf32>
    %269 = arith.mulf %267, %268 : vector<8x384xf32>
    %270 = arith.addf %263, %269 : vector<8x384xf32>
    %c0_152 = arith.constant 0 : index
    %c0_153 = arith.constant 0 : index
    %271 = vector.load %arg4[%c0_152, %c0_153] : memref<8x1xf32, #tpu.memory_space<vmem>>, vector<8x1xf32>
    %272 = vector.broadcast %271 : vector<8x1xf32> to vector<8x384xf32>
    %273 = arith.addf %270, %272 : vector<8x384xf32>
    %274 = vector.broadcast %3 : vector<1x384xf32> to vector<8x384xf32>
    %275 = arith.mulf %273, %274 : vector<8x384xf32>
    %c0_154 = arith.constant 0 : index
    %c0_155 = arith.constant 0 : index
    %c0_156 = arith.constant 0 : index
    %276 = vector.load %arg7[%c0_154, %c0_155, %c0_156] : memref<1x8x384xf32, #tpu.memory_space<vmem>>, vector<1x8x384xf32>
    %277 = vector.shape_cast %276 : vector<1x8x384xf32> to vector<8x384xf32>
    %278 = vector.shape_cast %275 : vector<8x384xf32> to vector<1x8x384xf32>
    tpu.vector_store %arg7[%c0_154, %c0_155, %c0_156], %278 {strides = array<i32>} : memref<1x8x384xf32, #tpu.memory_space<vmem>>, vector<1x8x384xf32>,
    %c0_157 = arith.constant 0 : index
    %c0_158 = arith.constant 0 : index
    %279 = vector.load %arg8[%c0_157, %c0_158] : memref<8x1xf32, #tpu.memory_space<vmem>>, vector<8x1xf32>
    %cst_159 = arith.constant dense<0.000000e+00> : vector<8xf32>
    %280 = vector.multi_reduction <add>, %275, %cst_159 [1] : vector<8x384xf32> to vector<8xf32>
    %281 = vector.shape_cast %280 : vector<8xf32> to vector<8x1xf32>
    %282 = arith.addf %279, %281 : vector<8x1xf32>
    %c0_160 = arith.constant 0 : index
    %c0_161 = arith.constant 0 : index
    %283 = vector.load %arg8[%c0_160, %c0_161] : memref<8x1xf32, #tpu.memory_space<vmem>>, vector<8x1xf32>
    tpu.vector_store %arg8[%c0_160, %c0_161], %282 {strides = array<i32>} : memref<8x1xf32, #tpu.memory_space<vmem>>, vector<8x1xf32>,
    %c0_162 = arith.constant 0 : index
    %c0_163 = arith.constant 0 : index
    %284 = vector.load %arg9[%c0_162, %c0_163] : memref<8x1xf32, #tpu.memory_space<vmem>>, vector<8x1xf32>
    %285 = arith.mulf %275, %275 : vector<8x384xf32>
    %cst_164 = arith.constant dense<0.000000e+00> : vector<8xf32>
    %286 = vector.multi_reduction <add>, %285, %cst_164 [1] : vector<8x384xf32> to vector<8xf32>
    %287 = vector.shape_cast %286 : vector<8xf32> to vector<8x1xf32>
    %288 = arith.addf %284, %287 : vector<8x1xf32>
    %c0_165 = arith.constant 0 : index
    %c0_166 = arith.constant 0 : index
    %289 = vector.load %arg9[%c0_165, %c0_166] : memref<8x1xf32, #tpu.memory_space<vmem>>, vector<8x1xf32>
    tpu.vector_store %arg9[%c0_165, %c0_166], %288 {strides = array<i32>} : memref<8x1xf32, #tpu.memory_space<vmem>>, vector<8x1xf32>,
    return
  }
  func.func @transform_0(%arg0: i32) -> (i32, i32) {
    %c0_i32 = arith.constant 0 : i32
    %c0_i32_0 = arith.constant 0 : i32
    %c0_i32_1 = arith.constant 0 : i32
    return %c0_i32, %c0_i32_0 : i32, i32
  }
  func.func @transform_1(%arg0: i32) -> (i32, i32, i32) {
    %c0_i32 = arith.constant 0 : i32
    %c0_i32_0 = arith.constant 0 : i32
    %c0_i32_1 = arith.constant 0 : i32
    return %arg0, %c0_i32, %c0_i32_0 : i32, i32, i32
  }
  func.func @transform_2(%arg0: i32) -> (i32, i32, i32, i32) {
    %c0_i32 = arith.constant 0 : i32
    %c0_i32_0 = arith.constant 0 : i32
    %c0_i32_1 = arith.constant 0 : i32
    %c0_i32_2 = arith.constant 0 : i32
    %c0_i32_3 = arith.constant 0 : i32
    return %c0_i32, %c0_i32_0, %c0_i32_1, %c0_i32_2 : i32, i32, i32, i32
  }
  func.func @transform_3(%arg0: i32) -> (i32, i32) {
    %c0_i32 = arith.constant 0 : i32
    %c0_i32_0 = arith.constant 0 : i32
    %c0_i32_1 = arith.constant 0 : i32
    return %c0_i32, %c0_i32_0 : i32, i32
  }
  func.func @transform_4(%arg0: i32) -> (i32, i32) {
    %c0_i32 = arith.constant 0 : i32
    %c0_i32_0 = arith.constant 0 : i32
    %c0_i32_1 = arith.constant 0 : i32
    return %c0_i32, %c0_i32_0 : i32, i32
  }
  func.func @transform_5(%arg0: i32) -> (i32, i32) {
    %c0_i32 = arith.constant 0 : i32
    %c0_i32_0 = arith.constant 0 : i32
    %c0_i32_1 = arith.constant 0 : i32
    return %c0_i32, %c0_i32_0 : i32, i32
  }
  func.func @transform_6(%arg0: i32) -> (i32, i32, i32) {
    %c0_i32 = arith.constant 0 : i32
    %c0_i32_0 = arith.constant 0 : i32
    %c0_i32_1 = arith.constant 0 : i32
    return %arg0, %c0_i32, %c0_i32_0 : i32, i32, i32
  }
  func.func @transform_7(%arg0: i32) -> (i32, i32) {
    %c0_i32 = arith.constant 0 : i32
    %c0_i32_0 = arith.constant 0 : i32
    %c0_i32_1 = arith.constant 0 : i32
    return %c0_i32, %c0_i32_0 : i32, i32
  }
  func.func @transform_8(%arg0: i32) -> (i32, i32) {
    %c0_i32 = arith.constant 0 : i32
    %c0_i32_0 = arith.constant 0 : i32
    %c0_i32_1 = arith.constant 0 : i32
    return %c0_i32, %c0_i32_0 : i32, i32
  }
}

</mosaic_0001>

<bundles_post_ra>
// kernel: tpu_custom_call.1
= control target key start
LH: loop header
LB: loop body
LE: loop exit
PB: predicated region body
PF: predicated region fallthrough
CT: control target
= control target key end

     0   :  { %14 = vsyncpa [#allocation4], 0  ;;  %s3387_s0 = inlined_call_operand.vmem [shape: f32[1,384], index: 0, kind: input, shape index: {}]   ;;  %s3388_s1 = inlined_call_operand.vmem [shape: f32[2,4,384], index: 1, kind: input, shape index: {}]   ;;  %s3389_s2 = inlined_call_operand.vmem [shape: f32[9,4,8,1], index: 2, kind: input, shape index: {}]   ;;  %s3390_s3 = inlined_call_operand.vmem [shape: f32[8,1], index: 3, kind: input, shape index: {}]   ;;  %s3391_s4 = inlined_call_operand.vmem [shape: f32[4,1], index: 4, kind: input, shape index: {}]   ;;  %s3392_s5 = inlined_call_operand.vmem [shape: f32[4,1], index: 5, kind: input, shape index: {}]   ;;  %s3393_s6 = inlined_call_operand.hbm [shape: f32[2,8,384], index: 6, kind: output, shape index: {0}]   ;;  %s3394_s7 = inlined_call_operand.vmem [shape: f32[8,1], index: 7, kind: output, shape index: {1}]   ;;  %s3395_s8 = inlined_call_operand.vmem [shape: f32[8,1], index: 8, kind: output, shape index: {2}]  }
   0x1   :  { %16 = vsyncpa [#allocation4 + $0x1], 0  ;;  %s2264_s27 = smov 0   ;;  %s2266_s28 = smov 0  }
   0x2   :  { %s2268_s29 = smov 0   ;;  %s2270_s4 = smov 0  }
   0x3 LB: > { %s2285_s5 = sadd.s32 4294967295, %s2205_s4   ;;  %s2046_s30 = sadd.s32 4294967294, %s2205_s4   ;;  %s2205_s4 = sphi %s2270_s4, %s3463_s4   ;;  %s2201_s29 = sphi %s2268_s29, %s3462_s29   ;;  %s2197_s28 = sphi %s2266_s28, %s3461_s28   ;;  %s2193_s27 = sphi %s2264_s27, %s3460_s27  }
   0x4   : > { %s2289_s9 = sadd.s32 1, %s2205_s4   ;;  %s160_s10 = sadd.s32 1, %s2201_s29 }
   0x5   : > { %s157_s11 = ssub.s32 %s2205_s4, %s2289_s9  ;;  %p170_p0 = scmp.ne.s32.totalorder %s2201_s29, %s2197_s28 }
   0x6   : > { %p158_p1 = scmp.eq.s32.totalorder %s157_s11, 0  ;;  %p171_p2 = scmp.eq.s32.totalorder %s2285_s5, 1 }
   0x7   : > { %p176_p3 = scmp.ne.s32.totalorder %s2197_s28, %s2193_s27  ;;  %p177_p4 = scmp.eq.s32.totalorder %s2046_s30, 1 }
   0x8   : > { %s2300_s12 = scalar_select %p158_p1, %s2201_s29, %s160_s10  }
   0x9   : > { %p2302_p5 = por %p171_p2, %p170_p0  ;;  %p2306_p6 = por %p177_p4, %p176_p3 }
   0xa   : > { %p2049_p7 = scmp.ge.s32.totalorder %s2205_s4, 1  ;;  %p260_p8 = scmp.lt.s32.totalorder %s2205_s4, 3 }
   0xc   : > { %p261_p9 = pnand %p2049_p7, %p260_p8 }
   0xe   : > { %264 = sbr.rel (%p261_p9) target bundleno = 903 (0x387), region = 44 }
  0x13   : > { %s287_s15 = sand.u32 1, %s2197_s28   ;;  %p294_p10 = scmp.lt.s32.totalorder %s2285_s5, 1 }
  0x14   : > { %s2090_s16 = smul.u32 24, %s287_s15  ;;  %p2051_p11 = scmp.ne.s32.totalorder %s2285_s5, 0 }
  0x15   : > { %s295_s17 = scalar_select %p294_p10, %s2285_s5, 1 }
  0x16   : > { %s2322_s22 = scalar_lea.vmem [#allocation3], %s2090_s16  ;;  %302 = sbr.rel (%p2051_p11) target bundleno = 31 (0x1f), region = 48 }
  0x17   : > { %s2091_s18 = smul.u32 12, %s295_s17 }
  0x19   : > { %s2320_s21 = scalar_lea.vmem %s3388_s1, %s2091_s18 }
  0x1b   : > { %vm306_vm0 = vcmask 7168   ;;  %v2207_v0 = vmov 0.0  }
  0x1c   : > { %303 = vst [vmem:[#allocation2] sm:$0xff] %v2207_v0  ;;  %304 = vst [vmem:[#allocation2 + $0x8] sm:$0xff] %v2207_v0 }
  0x1d   : > { %305 = vst [vmem:[#allocation2 + $0x10] sm:$0xf] %v2207_v0  ;;  %307 = vst.msk [vmem:[%s3394_s7] sm:$0xff] %vm306_vm0, %v2207_v0 }
  0x1e   : > { %308 = vst.msk [vmem:[%s3395_s8] sm:$0xff] %vm306_vm0, %v2207_v0 }
  0x1f PF: > { %v2053_v1 = vld [vmem:[%s3389_s2 + $0x10] sm:$0xff]  ;;  %v334_v2 = vld [vmem:[%s3389_s2] sm:$0xff]  ;;  %v313_v3 = vlaneseq  ;;  %v2208_v4 = vmov 0   ;;  %v2054_v6 = vld [vmem:[%s3389_s2 + $0x18] sm:$0xff]  ;;  %s2210_s19 = smov 126   ;;  %s2211_s20 = smov 110  }
  0x20   : > { %2144 = vset.pattern.permute.xlu1 %v2208_v4  ;;  %2143 = vset.pattern.permute.xlu0 %v2208_v4  ;;  %v2052_v7 = vld [vmem:[%s3389_s2 + $0x8] sm:$0xff]  ;;  %v2055_v12 = vld [vmem:[%s3389_s2 + $0x20] sm:$0xff]  ;;  %v2058_v21 = vld [vmem:[%s3389_s2 + $0x38] sm:$0xff]  ;;  %s2212_s11 = smov 109   ;;  %vm562_vm1 = vcmask 1039360   ;;  %vm699_vm2 = vcmask 1031168  }
  0x21   : > { %441 = vperm.xlu1 %2144, %v2053_v1   ;;  %337 = vperm.xlu0 %2143, %v334_v2   ;;  %v2337_v5 = vshrl.u32 %v313_v3, 7  ;;  %v2056_v11 = vld [vmem:[%s3389_s2 + $0x28] sm:$0xff]  ;;  %v309_v13 = vld [vmem:[%s3387_s0] sm:$0x7]  ;;  %v2057_v22 = vld [vmem:[%s3389_s2 + $0x30] sm:$0xff]  ;;  %vm836_vm3 = vcmask 900096  }
  0x22   : > { %v311_v14 = vld [vmem:[%s2320_s21 + $0x8] sm:$0xf]  ;;  %v310_v18 = vld [vmem:[%s2320_s21] sm:$0xff]  ;;  %v2062_v26 = vld [vmem:[%s3389_s2 + $0x58] sm:$0xff]  ;;  %s2209_s21 = smov 127   ;;  %s2214_s16 = smov 92  }
  0x23   : > { %v2346_v8 = vsub.s32 0, %v2337_v5  ;;  %v2349_v9 = vsub.s32 1, %v2337_v5  ;;  %v2352_v10 = vsub.s32 2, %v2337_v5  ;;  %v2060_v24 = vld [vmem:[%s3389_s2 + $0x48] sm:$0xff]  ;;  %v2059_v25 = vld [vmem:[%s3389_s2 + $0x40] sm:$0xff]  ;;  %v2061_v27 = vld [vmem:[%s3389_s2 + $0x50] sm:$0xff] }
  0x24   : > { %v348_v28 = vsub.s32 4, %v2337_v5  ;;  %v2064_v31 = vld [vmem:[%s3389_s2 + $0x68] sm:$0xff]  ;;  %v2063_v32 = vld [vmem:[%s3389_s2 + $0x60] sm:$0xff]  ;;  %v2066_v37 = vld [vmem:[%s3389_s2 + $0x78] sm:$0xff]  ;;  %v2454_v51 = vsub.s32 6, %v2337_v5  ;;  %v2457_v52 = vsub.s32 5, %v2337_v5 }
  0x25   : > { %492 = vperm.xlu1 %2144, %v2054_v6   ;;  %390 = vperm.xlu0 %2143, %v2052_v7   ;;  %v2365_v15 = vrot.slane %v309_v13, %v2346_v8  ;;  %v2368_v16 = vrot.slane %v309_v13, %v2349_v9  ;;  %v2371_v17 = vrot.slane %v309_v13, %v2352_v10  ;;  %v2065_v38 = vld [vmem:[%s3389_s2 + $0x70] sm:$0xff]  ;;  %v2067_v40 = vld [vmem:[%s3389_s2 + $0x80] sm:$0xff]  ;;  %v2068_v41 = vld [vmem:[%s3389_s2 + $0x88] sm:$0xff]  ;;  %v2460_v53 = vsub.s32 3, %v2337_v5  ;;  %s2215_s17 = smov 91   ;;  %s2216_s18 = smov 90  }
  0x26   : > { %v2069_v45 = vld [vmem:[%s3389_s2 + $0x90] sm:$0xff]  ;;  %v2070_v46 = vld [vmem:[%s3389_s2 + $0x98] sm:$0xff]  ;;  %v2071_v49 = vld [vmem:[%s3389_s2 + $0xa0] sm:$0xff]  ;;  %v2463_v54 = vsub.s32 7, %v2337_v5  ;;  %vm1000_vm4 = vcmask 891904   ;;  %vm1242_vm5 = vcmask 883712  }
  0x27   : > { %3422 = vst [vmem:[#allocation6_spill] sm:$0xff] %v2365_v15  ;;  %3423 = vst [vmem:[#allocation7_spill] sm:$0xff] %v2368_v16  ;;  %v326_v19 = vcombine.low %v2365_v15, %v2368_v16  ;;  %v329_v20 = vmul.f32 %v2371_v17, %v311_v14  ;;  %vm1487_vm6 = vcmask 752640   ;;  %vm1624_vm7 = vcmask 744448   ;;  %s2217_s23 = smov 19   ;;  %s2092_s24 = smul.u32 384, %s2285_s5 }
  0x28   : > { %3424 = vst [vmem:[#allocation8_spill] sm:$0xff] %v2371_v17  ;;  %vm1761_vm8 = vcmask 736256   ;;  %vm1913_vm9 = vcmask 154624   ;;  %s1975_s25 = sshll.u32 %s2322_s22, 4  ;;  %s1976_s25 = int_to_ptr.vmem [resolvable:$true] %s1975_s25 }
  0x29   : > { %578 = vperm.xlu1 %2144, %v2056_v11   ;;  %543 = vperm.xlu0 %2143, %v2055_v12   ;;  %v2383_v23 = vmul.f32 %v326_v19, %v310_v18  ;;  %331 = vst [vmem:[#allocation2 + $0xc] sm:$0xf] %v329_v20  ;;  %s1973_s10 = scalar_lea.hbm %s3393_s6, %s2092_s24 }
  0x2b   : > { %330 = vst [vmem:[#allocation2 + $0x4] sm:$0xff] %v2383_v23  ;;  %v968_v39 = vrot.slane %v2383_v23, %v348_v28  ;;  %v964_v42 = vrot.slane %v2383_v23, %v2346_v8 }
  0x2d   : > { %646 = vperm.xlu1 %2144, %v2058_v21   ;;  %612 = vperm.xlu0 %2143, %v2057_v22   ;;  %v2433_v43 = vrot.slane %v968_v39, %v2346_v8  ;;  %v2436_v44 = vrot.slane %v964_v42, %v2346_v8 }
  0x2f   : > { %3425 = vst [vmem:[#allocation9_spill] sm:$0xff] %v2433_v43  ;;  %3426 = vst [vmem:[#allocation10_spill] sm:$0xff] %v2436_v44 }
  0x30   : > { %v2444_v47 = vld [vmem:[#allocation2 + $0xc] sm:$0xff] }
  0x31   : > { %715 = vperm.xlu1 %2144, %v2060_v24   ;;  %680 = vperm.xlu0 %2143, %v2059_v25   ;;  %v1205_v48 = vrot.slane %v2444_v47, %v348_v28 }
  0x32   : > { %v2399_v29 = vld [vmem:[#allocation2] sm:$0xff]  ;;  %v2401_v30 = vld [vmem:[#allocation2 + $0x8] sm:$0xff] }
  0x33   : > { %v349_v33 = vrot.slane %v2399_v29, %v348_v28  ;;  %v357_v34 = vrot.slane %v2401_v30, %v348_v28  ;;  %v2451_v50 = vrot.slane %v1205_v48, %v2346_v8  ;;  %v451_v55 = vrot.slane %v2399_v29, %v2454_v51 }
  0x34   : > { %v455_v56 = vrot.slane %v2401_v30, %v2352_v10  ;;  %v345_v57 = vrot.slane %v2399_v29, %v2346_v8  ;;  %v396_v58 = vrot.slane %v2399_v29, %v2349_v9  ;;  %v400_v59 = vrot.slane %v2399_v29, %v2457_v52 }
  0x35   : > { %783 = vperm.xlu1 %2144, %v2062_v26   ;;  %749 = vperm.xlu0 %2143, %v2061_v27   ;;  %v2412_v35 = vrot.slane %v349_v33, %v2346_v8  ;;  %v2415_v36 = vrot.slane %v357_v34, %v2346_v8  ;;  %3427 = vst [vmem:[#allocation11_spill] sm:$0xff] %v2451_v50 }
  0x36   : > { %v353_v60 = vrot.slane %v2401_v30, %v2346_v8  ;;  %v404_v61 = vrot.slane %v2401_v30, %v2349_v9  ;;  %v408_v62 = vrot.slane %v2401_v30, %v2457_v52  ;;  %v447_v63 = vrot.slane %v2399_v29, %v2352_v10 }
  0x37   : > { %v459_v0 = vrot.slane %v2401_v30, %v2454_v51  ;;  %v502_v1 = vrot.slane %v2399_v29, %v2463_v54  ;;  %v506_v2 = vrot.slane %v2401_v30, %v2460_v53  ;;  %v2490_v3 = vrot.slane %v451_v55, %v2352_v10 }
  0x38   : > { %v2493_v4 = vrot.slane %v455_v56, %v2352_v10  ;;  %v498_v6 = vrot.slane %v2399_v29, %v2460_v53  ;;  %v510_v7 = vrot.slane %v2401_v30, %v2463_v54  ;;  %v2500_v12 = vrot.slane %v345_v57, %v2346_v8 }
  0x39   : > { %852 = vperm.xlu1 %2144, %v2064_v31   ;;  %817 = vperm.xlu0 %2143, %v2063_v32   ;;  %v2503_v13 = vrot.slane %v396_v58, %v2349_v9  ;;  %v2506_v14 = vrot.slane %v400_v59, %v2349_v9  ;;  %v2509_v18 = vrot.slane %v353_v60, %v2346_v8 }
  0x3a   : > { %v2512_v19 = vrot.slane %v404_v61, %v2349_v9  ;;  %v2515_v20 = vrot.slane %v408_v62, %v2349_v9  ;;  %v2518_v21 = vrot.slane %v447_v63, %v2352_v10  ;;  %v2521_v22 = vrot.slane %v459_v0, %v2352_v10 }
  0x3b   : > { %v2524_v24 = vrot.slane %v502_v1, %v2460_v53  ;;  %v2527_v25 = vrot.slane %v506_v2, %v2460_v53  ;;  %v2532_v29 = vrot.slane %v498_v6, %v2460_v53  ;;  %v2535_v30 = vrot.slane %v510_v7, %v2460_v53 }
  0x3d   : > { %920 = vperm.xlu1 %2144, %v2066_v37   ;;  %886 = vperm.xlu0 %2143, %v2065_v38  }
  0x41   : > { %956 = vperm.xlu1 %2144, %v2067_v40   ;;  %1015 = vperm.xlu0 %2143, %v2068_v41  }
  0x45   : > { %1071 = vperm.xlu1 %2144, %v2069_v45   ;;  %1127 = vperm.xlu0 %2143, %v2070_v46  }
  0x49   : > { %1185 = vperm.xlu1 %2144, %v2071_v49  }
  0x9c   : > { %v338_v5 = vpop.permute.xlu0 %337  ;;  %v442_v11 = vpop.permute.xlu1 %441 }
  0x9d   : > { %v481_v26 = vmul.f32 %v2490_v3, %v442_v11  ;;  %v482_v27 = vmul.f32 %v2493_v4, %v442_v11  ;;  %v378_v31 = vmul.f32 %v2500_v12, %v338_v5  ;;  %v379_v32 = vmul.f32 %v2412_v35, %v338_v5 }
  0x9e   : > { %v380_v37 = vmul.f32 %v2509_v18, %v338_v5  ;;  %v381_v38 = vmul.f32 %v2415_v36, %v338_v5  ;;  %v480_v41 = vmul.f32 %v2518_v21, %v442_v11  ;;  %v483_v42 = vmul.f32 %v2521_v22, %v442_v11 }
  0xa0   : > { %v391_v28 = vpop.permute.xlu0 %390  ;;  %v493_v45 = vpop.permute.xlu1 %492 }
  0xa1   : > { %v429_v33 = vmul.f32 %v2503_v13, %v391_v28  ;;  %v430_v34 = vmul.f32 %v2506_v14, %v391_v28  ;;  %v431_v39 = vmul.f32 %v2512_v19, %v391_v28  ;;  %v432_v40 = vmul.f32 %v2515_v20, %v391_v28 }
  0xa2   : > { %v532_v49 = vmul.f32 %v2524_v24, %v493_v45  ;;  %v533_v55 = vmul.f32 %v2527_v25, %v493_v45  ;;  %v531_v63 = vmul.f32 %v2532_v29, %v493_v45  ;;  %v534_v1 = vmul.f32 %v2535_v30, %v493_v45 }
  0xa3   : > { %v434_v46 = vadd.f32 %v430_v34, %v379_v32  ;;  %v433_v48 = vadd.f32 %v429_v33, %v378_v31  ;;  %v435_v56 = vadd.f32 %v431_v39, %v380_v37  ;;  %v436_v58 = vadd.f32 %v432_v40, %v381_v38 }
  0xa4   : > { %v544_v57 = vpop.permute.xlu0 %543 }
  0xa5   : > { %v485_v59 = vadd.f32 %v481_v26, %v434_v46  ;;  %v547_v60 = vmul.f32 %v544_v57, %v2412_v35  ;;  %v546_v61 = vmul.f32 %v544_v57, %v2500_v12  ;;  %v486_v62 = vadd.f32 %v482_v27, %v435_v56  ;;  %v579_v26 = vpop.permute.xlu1 %578 }
  0xa6   : > { %v484_v0 = vadd.f32 %v480_v41, %v433_v48  ;;  %v487_v2 = vadd.f32 %v483_v42, %v436_v58  ;;  %v549_v7 = vmul.f32 %v544_v57, %v2415_v36  ;;  %v548_v11 = vmul.f32 %v544_v57, %v2509_v18 }
  0xa7   : > { %556 = vrot.lane.b32.xlu0 %v547_v60, %s2209_s21  ;;  %554 = vrot.lane.b32.xlu1 %v546_v61, %s2209_s21  ;;  %v2555_v5 = vadd.f32 %v532_v49, %v485_v59  ;;  %v2557_v6 = vadd.f32 %v533_v55, %v486_v62  ;;  %v581_v31 = vmul.f32 %v579_v26, %v2503_v13 }
  0xa8   : > { %v2563_v27 = vadd.f32 %v531_v63, %v484_v0  ;;  %v2565_v28 = vadd.f32 %v534_v1, %v487_v2  ;;  %v582_v32 = vmul.f32 %v579_v26, %v2506_v14  ;;  %v583_v33 = vmul.f32 %v579_v26, %v2512_v19  ;;  %v613_v37 = vpop.permute.xlu0 %612 }
  0xa9   : > { %v584_v34 = vmul.f32 %v579_v26, %v2515_v20  ;;  %v616_v38 = vmul.f32 %v613_v37, %v2490_v3  ;;  %v615_v39 = vmul.f32 %v613_v37, %v2518_v21  ;;  %v618_v40 = vmul.f32 %v613_v37, %v2521_v22  ;;  %v647_v42 = vpop.permute.xlu1 %646 }
  0xaa   : > { %v617_v41 = vmul.f32 %v613_v37, %v2493_v4  ;;  %v649_v45 = vmul.f32 %v647_v42, %v2532_v29  ;;  %v650_v46 = vmul.f32 %v647_v42, %v2524_v24  ;;  %v651_v48 = vmul.f32 %v647_v42, %v2527_v25 }
  0xab   : > { %560 = vrot.lane.b32.xlu0 %v549_v7, %s2209_s21  ;;  %558 = vrot.lane.b32.xlu1 %v548_v11, %s2209_s21  ;;  %v652_v49 = vmul.f32 %v647_v42, %v2535_v30 }
  0xac   : > { %v681_v55 = vpop.permute.xlu0 %680 }
  0xad   : > { %v684_v56 = vmul.f32 %v681_v55, %v2412_v35  ;;  %v683_v57 = vmul.f32 %v681_v55, %v2500_v12  ;;  %v686_v58 = vmul.f32 %v681_v55, %v2415_v36  ;;  %v685_v59 = vmul.f32 %v681_v55, %v2509_v18  ;;  %v716_v60 = vpop.permute.xlu1 %715  ;;  %v2076_v55 = vld [vmem:[%s3389_s2 + $0xc8] sm:$0xff] }
  0xae   : > { %v718_v61 = vmul.f32 %v716_v60, %v2503_v13  ;;  %v719_v62 = vmul.f32 %v716_v60, %v2506_v14  ;;  %v720_v63 = vmul.f32 %v716_v60, %v2512_v19  ;;  %v721_v0 = vmul.f32 %v716_v60, %v2515_v20 }
  0xaf   : > { %589 = vrot.lane.b32.xlu0 %v581_v31, %s2209_s21  ;;  %591 = vrot.lane.b32.xlu1 %v582_v32, %s2209_s21 }
  0xb0   : > { %v750_v1 = vpop.permute.xlu0 %749 }
  0xb1   : > { %v753_v2 = vmul.f32 %v750_v1, %v2490_v3  ;;  %v752_v7 = vmul.f32 %v750_v1, %v2518_v21  ;;  %v755_v11 = vmul.f32 %v750_v1, %v2521_v22  ;;  %v754_v26 = vmul.f32 %v750_v1, %v2493_v4  ;;  %v784_v31 = vpop.permute.xlu1 %783  ;;  %v2085_v1 = vld [vmem:[%s3389_s2 + $0x110] sm:$0xff] }
  0xb2   : > { %v786_v32 = vmul.f32 %v784_v31, %v2532_v29  ;;  %v789_v37 = vmul.f32 %v784_v31, %v2535_v30 }
  0xb3   : > { %593 = vrot.lane.b32.xlu0 %v583_v33, %s2209_s21  ;;  %595 = vrot.lane.b32.xlu1 %v584_v34, %s2209_s21  ;;  %v787_v33 = vmul.f32 %v784_v31, %v2524_v24  ;;  %v788_v34 = vmul.f32 %v784_v31, %v2527_v25 }
  0xb7   : > { %625 = vrot.lane.b32.xlu0 %v616_v38, %s2209_s21  ;;  %623 = vrot.lane.b32.xlu1 %v615_v39, %s2209_s21  ;;  %v818_v38 = vpop.permute.xlu0 %817 }
  0xb8   : > { %v821_v39 = vmul.f32 %v818_v38, %v2412_v35  ;;  %v822_v42 = vmul.f32 %v818_v38, %v2509_v18 }
  0xbb   : > { %629 = vrot.lane.b32.xlu0 %v618_v40, %s2209_s21  ;;  %627 = vrot.lane.b32.xlu1 %v617_v41, %s2209_s21  ;;  %v820_v40 = vmul.f32 %v818_v38, %v2500_v12  ;;  %v823_v41 = vmul.f32 %v818_v38, %v2415_v36  ;;  %v887_v36 = vpop.permute.xlu0 %886 }
  0xbc   : > { %v890_v18 = vmul.f32 %v887_v36, %v2490_v3 }
  0xbf   : > { %657 = vrot.lane.b32.xlu0 %v649_v45, %s2209_s21  ;;  %659 = vrot.lane.b32.xlu1 %v650_v46, %s2209_s21  ;;  %v853_v45 = vpop.permute.xlu1 %852  ;;  %v1016_v60 = vpop.permute.xlu0 %1015 }
  0xc0   : > { %v855_v46 = vmul.f32 %v853_v45, %v2503_v13  ;;  %v856_v35 = vmul.f32 %v853_v45, %v2506_v14  ;;  %v857_v12 = vmul.f32 %v853_v45, %v2512_v19  ;;  %v892_v13 = vmul.f32 %v887_v36, %v2521_v22  ;;  %v2074_v22 = vld [vmem:[%s3389_s2 + $0xb8] sm:$0xff] }
  0xc1   : > { %v891_v14 = vmul.f32 %v887_v36, %v2493_v4  ;;  %v2075_v4 = vld [vmem:[%s3389_s2 + $0xc0] sm:$0xff] }
  0xc3   : > { %661 = vrot.lane.b32.xlu0 %v651_v48, %s2209_s21  ;;  %663 = vrot.lane.b32.xlu1 %v652_v49, %s2209_s21  ;;  %v858_v48 = vmul.f32 %v853_v45, %v2515_v20  ;;  %v889_v49 = vmul.f32 %v887_v36, %v2518_v21  ;;  %v921_v19 = vpop.permute.xlu1 %920  ;;  %v2073_v20 = vld [vmem:[%s3389_s2 + $0xb0] sm:$0xff]  ;;  %v2072_v21 = vld [vmem:[%s3389_s2 + $0xa8] sm:$0xff] }
  0xc4   : > { %v923_v3 = vmul.f32 %v921_v19, %v2532_v29  ;;  %v2077_v29 = vld [vmem:[%s3389_s2 + $0xd0] sm:$0xff]  ;;  %v926_v38 = vmul.f32 %v921_v19, %v2535_v30  ;;  %v925_v45 = vmul.f32 %v921_v19, %v2527_v25 }
  0xc7   : > { %693 = vrot.lane.b32.xlu0 %v684_v56, %s2210_s19  ;;  %691 = vrot.lane.b32.xlu1 %v683_v57, %s2210_s19  ;;  %v2079_v56 = vld [vmem:[%s3389_s2 + $0xe0] sm:$0xff]  ;;  %v957_v57 = vpop.permute.xlu1 %956 }
  0xcb   : > { %697 = vrot.lane.b32.xlu0 %v686_v58, %s2210_s19  ;;  %695 = vrot.lane.b32.xlu1 %v685_v59, %s2210_s19  ;;  %v2078_v58 = vld [vmem:[%s3389_s2 + $0xd8] sm:$0xff]  ;;  %v2081_v59 = vld [vmem:[%s3389_s2 + $0xf0] sm:$0xff] }
  0xcf   : > { %726 = vrot.lane.b32.xlu0 %v718_v61, %s2210_s19  ;;  %728 = vrot.lane.b32.xlu1 %v719_v62, %s2210_s19  ;;  %v2676_v61 = vpop.permute.xlu1 %1071  ;;  %v2080_v62 = vld [vmem:[%s3389_s2 + $0xe8] sm:$0xff] }
  0xd3   : > { %730 = vrot.lane.b32.xlu0 %v720_v63, %s2210_s19  ;;  %732 = vrot.lane.b32.xlu1 %v721_v0, %s2210_s19  ;;  %v2083_v63 = vld [vmem:[%s3389_s2 + $0x100] sm:$0xff]  ;;  %v2082_v0 = vld [vmem:[%s3389_s2 + $0xf8] sm:$0xff] }
  0xd7   : > { %762 = vrot.lane.b32.xlu0 %v753_v2, %s2210_s19  ;;  %760 = vrot.lane.b32.xlu1 %v752_v7, %s2210_s19  ;;  %v2690_v2 = vpop.permute.xlu0 %1127  ;;  %v2692_v7 = vpop.permute.xlu1 %1185 }
  0xdb   : > { %766 = vrot.lane.b32.xlu0 %v755_v11, %s2210_s19  ;;  %764 = vrot.lane.b32.xlu1 %v754_v26, %s2210_s19  ;;  %v2084_v11 = vld [vmem:[%s3389_s2 + $0x108] sm:$0xff] }
  0xdf   : > { %794 = vrot.lane.b32.xlu0 %v786_v32, %s2210_s19  ;;  %796 = vrot.lane.b32.xlu1 %v787_v33, %s2210_s19  ;;  %v924_v32 = vmul.f32 %v921_v19, %v2524_v24  ;;  %v2086_v33 = vld [vmem:[%s3389_s2 + $0x118] sm:$0xff] }
  0xe3   : > { %798 = vrot.lane.b32.xlu0 %v788_v34, %s2210_s19  ;;  %800 = vrot.lane.b32.xlu1 %v789_v37, %s2210_s19 }
  0xe7   : > { %830 = vrot.lane.b32.xlu0 %v821_v39, %s2211_s20  ;;  %828 = vrot.lane.b32.xlu1 %v820_v40, %s2211_s20  ;;  %v1021_v39 = vrot.slane %v2383_v23, %v2349_v9  ;;  %v951_v40 = vld [vmem:[#allocation2 + $0xc] sm:$0xf] }
  0xe8   : > { %v972_v24 = vrot.slane %v951_v40, %v2346_v8  ;;  %v1029_v30 = vrot.slane %v951_v40, %v2349_v9 }
  0xeb   : > { %834 = vrot.lane.b32.xlu0 %v823_v41, %s2211_s20  ;;  %832 = vrot.lane.b32.xlu1 %v822_v42, %s2211_s20 }
  0xef   : > { %863 = vrot.lane.b32.xlu0 %v855_v46, %s2211_s20  ;;  %865 = vrot.lane.b32.xlu1 %v856_v35, %s2211_s20  ;;  %v989_v46 = vmul.f32 %v2433_v43, %v957_v57  ;;  %v2722_v35 = vrot.slane %v1021_v39, %v2349_v9 }
  0xf1   : > { %3428 = vst [vmem:[#allocation12_spill] sm:$0xff] %v2722_v35 }
  0xf3   : > { %867 = vrot.lane.b32.xlu0 %v857_v12, %s2211_s20  ;;  %869 = vrot.lane.b32.xlu1 %v858_v48, %s2211_s20  ;;  %v987_v12 = vrot.slane %v972_v24, %v2346_v8  ;;  %v1025_v48 = vrot.slane %v2383_v23, %v2457_v52 }
  0xf5   : > { %v2742_v19 = vrot.slane %v1025_v48, %v2349_v9 }
  0xf7   : > { %899 = vrot.lane.b32.xlu0 %v890_v18, %s2211_s20  ;;  %897 = vrot.lane.b32.xlu1 %v889_v49, %s2211_s20  ;;  %v988_v18 = vmul.f32 %v2436_v44, %v957_v57  ;;  %v1045_v49 = vmul.f32 %v2722_v35, %v1016_v60  ;;  %3429 = vst [vmem:[#allocation13_spill] sm:$0xff] %v2742_v19 }
  0xfb   : > { %903 = vrot.lane.b32.xlu0 %v892_v13, %s2211_s20  ;;  %901 = vrot.lane.b32.xlu1 %v891_v14, %s2211_s20  ;;  %v1044_v13 = vrot.slane %v1029_v30, %v2349_v9  ;;  %v1081_v14 = vrot.slane %v2383_v23, %v2454_v51 }
  0xff   : > { %931 = vrot.lane.b32.xlu0 %v923_v3, %s2211_s20  ;;  %1328 = vperm.xlu1 %2144, %v2073_v20   ;;  %v1077_v20 = vrot.slane %v2383_v23, %v2352_v10 }
 0x103   : > { %1258 = vperm.xlu0 %2143, %v2072_v21   ;;  %1468 = vperm.xlu1 %2144, %v2075_v4   ;;  %v990_v4 = vmul.f32 %v987_v12, %v957_v57  ;;  %v1046_v57 = vmul.f32 %v2742_v19, %v1016_v60 }
 0x107   : > { %1398 = vperm.xlu0 %2143, %v2074_v22   ;;  %1537 = vperm.xlu1 %2144, %v2077_v29   ;;  %v1047_v22 = vmul.f32 %v1044_v13, %v1016_v60  ;;  %v2751_v29 = vrot.slane %v1081_v14, %v2352_v10 }
 0x10b   : > { %1503 = vperm.xlu0 %2143, %v2076_v55   ;;  %1605 = vperm.xlu1 %2144, %v2079_v56   ;;  %v1133_v55 = vrot.slane %v2383_v23, %v2460_v53  ;;  %v1085_v56 = vrot.slane %v951_v40, %v2352_v10 }
 0x10d   : > { %v1100_v39 = vrot.slane %v1085_v56, %v2352_v10 }
 0x10f   : > { %1571 = vperm.xlu0 %2143, %v2078_v58   ;;  %1674 = vperm.xlu1 %2144, %v2081_v59   ;;  %v1141_v58 = vrot.slane %v951_v40, %v2460_v53 }
 0x111   : > { %v1156_v40 = vrot.slane %v1141_v58, %v2460_v53 }
 0x113   : > { %1640 = vperm.xlu0 %2143, %v2080_v62   ;;  %1742 = vperm.xlu1 %2144, %v2083_v63   ;;  %v1102_v63 = vmul.f32 %v2751_v29, %v2676_v61 }
 0x117   : > { %1708 = vperm.xlu0 %2143, %v2082_v0   ;;  %1811 = vperm.xlu1 %2144, %v2085_v1   ;;  %v2767_v0 = vrot.slane %v1077_v20, %v2352_v10  ;;  %v2770_v1 = vrot.slane %v1133_v55, %v2460_v53  ;;  %v1226_v20 = vmul.f32 %v2692_v7, %v2436_v44 }
 0x119   : > { %v2697_v26 = vpop.permute.xlu0 %556  ;;  %v2699_v31 = vpop.permute.xlu1 %554  ;;  %v1101_v60 = vmul.f32 %v2767_v0, %v2676_v61 }
 0x11b   : > { %1777 = vperm.xlu0 %2143, %v2084_v11   ;;  %933 = vrot.lane.b32.xlu1 %v924_v32, %s2211_s20  ;;  %v1137_v11 = vrot.slane %v2383_v23, %v2463_v54 }
 0x11d   : > { %v2706_v34 = vpop.permute.xlu0 %560  ;;  %v2708_v37 = vpop.permute.xlu1 %558  ;;  %v2795_v30 = vrot.slane %v1137_v11, %v2460_v53 }
 0x11f   : > { %1845 = vperm.xlu0 %2143, %v2086_v33   ;;  %937 = vrot.lane.b32.xlu1 %v926_v38, %s2211_s20  ;;  %v1157_v38 = vmul.f32 %v2770_v1, %v2690_v2 }
 0x121   : > { %v2715_v41 = vpop.permute.xlu0 %589  ;;  %v2717_v42 = vpop.permute.xlu1 %591 }
 0x123   : > { %935 = vrot.lane.b32.xlu0 %v925_v45, %s2211_s20  ;;  %996 = vrot.lane.b32.xlu1 %v989_v46, %s2212_s11  ;;  %v1103_v45 = vmul.f32 %v1100_v39, %v2676_v61  ;;  %v1159_v46 = vmul.f32 %v1156_v40, %v2690_v2  ;;  %v1201_v61 = vrot.slane %v2444_v47, %v2346_v8  ;;  %s2213_s20 = smov 108  }
 0x125   : > { %v2730_v36 = vpop.permute.xlu0 %593  ;;  %v2732_v25 = vpop.permute.xlu1 %595 }
 0x127   : > { %994 = vrot.lane.b32.xlu0 %v988_v18, %s2212_s11  ;;  %1051 = vrot.lane.b32.xlu1 %v1045_v49, %s2212_s11  ;;  %v1158_v18 = vmul.f32 %v2795_v30, %v2690_v2  ;;  %v1227_v49 = vmul.f32 %v2692_v7, %v2433_v43  ;;  %v1229_v2 = vmul.f32 %v2451_v50, %v2692_v7 }
 0x128   : > { %v1272_v43 = vrot.slane %v2444_v47, %v2349_v9 }
 0x129   : > { %v2746_v3 = vpop.permute.xlu0 %625  ;;  %v2748_v21 = vpop.permute.xlu1 %623 }
 0x12b   : > { %998 = vrot.lane.b32.xlu0 %v990_v4, %s2212_s11  ;;  %1055 = vrot.lane.b32.xlu1 %v1047_v22, %s2212_s11  ;;  %v2820_v4 = vrot.slane %v1201_v61, %v2346_v8 }
 0x12d   : > { %v2759_v59 = vpop.permute.xlu0 %629  ;;  %v2761_v62 = vpop.permute.xlu1 %627  ;;  %3430 = vst [vmem:[#allocation14_spill] sm:$0xff] %v2820_v4  ;;  %v1228_v56 = vmul.f32 %v2820_v4, %v2692_v7 }
 0x12f   : > { %1053 = vrot.lane.b32.xlu0 %v1046_v57, %s2212_s11  ;;  %1109 = vrot.lane.b32.xlu1 %v1102_v63, %s2212_s11 }
 0x131   : > { %v2776_v32 = vpop.permute.xlu0 %657  ;;  %v2778_v33 = vpop.permute.xlu1 %659 }
 0x133   : > { %1107 = vrot.lane.b32.xlu0 %v1101_v60, %s2212_s11  ;;  %1163 = vrot.lane.b32.xlu1 %v1157_v38, %s2212_s11 }
 0x135   : > { %v2788_v24 = vpop.permute.xlu0 %661  ;;  %v2790_v23 = vpop.permute.xlu1 %663 }
 0x137   : > { %1111 = vrot.lane.b32.xlu0 %v1103_v45, %s2212_s11  ;;  %1167 = vrot.lane.b32.xlu1 %v1159_v46, %s2212_s11 }
 0x139   : > { %v2799_v12 = vpop.permute.xlu0 %693  ;;  %v2801_v48 = vpop.permute.xlu1 %691 }
 0x13b   : > { %1165 = vrot.lane.b32.xlu0 %v1158_v18, %s2212_s11  ;;  %1236 = vrot.lane.b32.xlu1 %v1227_v49, %s2213_s20 }
 0x13d   : > { %v2811_v13 = vpop.permute.xlu0 %697  ;;  %v2813_v14 = vpop.permute.xlu1 %695 }
 0x13f   : > { %1234 = vrot.lane.b32.xlu0 %v1226_v20, %s2213_s20  ;;  %1240 = vrot.lane.b32.xlu1 %v1229_v2, %s2213_s20 }
 0x141   : > { %v2824_v22 = vpop.permute.xlu0 %726  ;;  %v2826_v55 = vpop.permute.xlu1 %728 }
 0x143   : > { %1238 = vrot.lane.b32.xlu0 %v1228_v56, %s2213_s20 }
 0x145   : > { %v2831_v58 = vpop.permute.xlu0 %730  ;;  %v2833_v57 = vpop.permute.xlu1 %732 }
 0x149   : > { %v2835_v63 = vpop.permute.xlu0 %762  ;;  %v2837_v8 = vpop.permute.xlu1 %760 }
 0x14d   : > { %v2839_v11 = vpop.permute.xlu0 %766  ;;  %v2841_v60 = vpop.permute.xlu1 %764 }
 0x151   : > { %v2843_v38 = vpop.permute.xlu0 %794  ;;  %v2845_v39 = vpop.permute.xlu1 %796 }
 0x155   : > { %v2847_v40 = vpop.permute.xlu0 %798  ;;  %v2849_v7 = vpop.permute.xlu1 %800 }
 0x156   : > { %3431 = vst [vmem:[#allocation15_spill] sm:$0xff] %v2847_v40 }
 0x159   : > { %v2851_v45 = vpop.permute.xlu0 %830  ;;  %v2853_v46 = vpop.permute.xlu1 %828 }
 0x15d   : > { %v2855_v18 = vpop.permute.xlu0 %834  ;;  %v2857_v49 = vpop.permute.xlu1 %832 }
 0x15e   : > { %3432 = vst [vmem:[#allocation16_spill] sm:$0xff] %v2855_v18  ;;  %3433 = vst [vmem:[#allocation17_spill] sm:$0xff] %v2857_v49  ;;  %v1276_v49 = vrot.slane %v2444_v47, %v2457_v52  ;;  %v1346_v52 = vrot.slane %v2444_v47, %v2454_v51  ;;  %v1416_v51 = vrot.slane %v2444_v47, %v2463_v54 }
 0x161   : > { %v2859_v61 = vpop.permute.xlu0 %863  ;;  %v2861_v20 = vpop.permute.xlu1 %865 }
 0x165   : > { %v2863_v2 = vpop.permute.xlu0 %867  ;;  %v2865_v56 = vpop.permute.xlu1 %869 }
 0x166   : > { %3434 = vst [vmem:[#allocation18_spill] sm:$0xff] %v2863_v2  ;;  %3435 = vst [vmem:[#allocation19_spill] sm:$0xff] %v2865_v56 }
 0x169   : > { %v2867_v17 = vpop.permute.xlu0 %899  ;;  %v2869_v16 = vpop.permute.xlu1 %897 }
 0x16d   : > { %v2871_v15 = vpop.permute.xlu0 %903  ;;  %v2873_v4 = vpop.permute.xlu1 %901 }
 0x16e   : > { %3436 = vst [vmem:[#allocation20_spill] sm:$0xff] %v2871_v15  ;;  %3437 = vst [vmem:[#allocation21_spill] sm:$0xff] %v2873_v4  ;;  %v2886_v15 = vrot.slane %v1272_v43, %v2349_v9  ;;  %v2889_v4 = vrot.slane %v1276_v49, %v2349_v9  ;;  %v597_v43 = vsel %vm562_vm1, %v2715_v41, %v2717_v42 }
 0x16f   : > { %v631_v41 = vsel %vm562_vm1, %v2748_v21, %v2746_v3 }
 0x171   : > { %v2875_v50 = vpop.permute.xlu0 %931 }
 0x172   : > { %3438 = vst [vmem:[#allocation22_spill] sm:$0xff] %v2875_v50  ;;  %v563_v50 = vsel %vm562_vm1, %v2699_v31, %v2697_v26  ;;  %v1412_v31 = vrot.slane %v2444_v47, %v2460_v53 }
 0x17a   : > { %v1329_v44 = vpop.permute.xlu1 %1328 }
 0x17e   : > { %v1259_v2 = vpop.permute.xlu0 %1258  ;;  %v2881_v56 = vpop.permute.xlu1 %1468 }
 0x17f   : > { %3439 = vst [vmem:[#allocation23_spill] sm:$0xff] %v2881_v56  ;;  %v1297_v18 = vmul.f32 %v1259_v2, %v2722_v35  ;;  %v1298_v40 = vmul.f32 %v1259_v2, %v2742_v19  ;;  %v1342_v56 = vrot.slane %v2444_v47, %v2352_v10  ;;  %v570_v35 = vadd.f32 %v563_v50, %v2563_v27 }
 0x180   : > { %v2918_v19 = vrot.slane %v1346_v52, %v2352_v10  ;;  %v564_v47 = vsel %vm562_vm1, %v2697_v26, %v2708_v37  ;;  %v565_v50 = vsel %vm562_vm1, %v2708_v37, %v2706_v34  ;;  %v573_v27 = vadd.f32 %v2706_v34, %v2565_v28 }
 0x181   : > { %1305 = vrot.lane.b32.xlu0 %v1297_v18, %s2213_s20  ;;  %1307 = vrot.lane.b32.xlu1 %v1298_v40, %s2213_s20  ;;  %v1299_v18 = vmul.f32 %v2886_v15, %v1259_v2  ;;  %v1300_v40 = vmul.f32 %v2889_v4, %v1259_v2  ;;  %v604_v54 = vadd.f32 %v597_v43, %v570_v35 }
 0x182   : > { %v2903_v9 = vpop.permute.xlu0 %1398  ;;  %v2905_v49 = vpop.permute.xlu1 %1537  ;;  %v2941_v2 = vrot.slane %v1412_v31, %v2460_v53  ;;  %v2944_v37 = vrot.slane %v1416_v51, %v2460_v53  ;;  %v598_v35 = vsel %vm562_vm1, %v2717_v42, %v2730_v36  ;;  %v1368_v28 = vmul.f32 %v1329_v44, %v2751_v29 }
 0x183   : > { %3440 = vst [vmem:[#allocation24_spill] sm:$0xff] %v2905_v49  ;;  %v2921_v49 = vrot.slane %v1342_v56, %v2352_v10  ;;  %v665_v10 = vsel %vm562_vm1, %v2776_v32, %v2778_v33  ;;  %v638_v56 = vadd.f32 %v631_v41, %v604_v54  ;;  %v1367_v34 = vmul.f32 %v1329_v44, %v2767_v0 }
 0x184   : > { %v571_v32 = vadd.f32 %v564_v47, %v2555_v5  ;;  %v572_v52 = vadd.f32 %v565_v50, %v2557_v6  ;;  %v607_v43 = vadd.f32 %v2732_v25, %v573_v27  ;;  %v700_v53 = vsel %vm699_vm2, %v2801_v48, %v2799_v12 }
 0x185   : > { %1309 = vrot.lane.b32.xlu0 %v1299_v18, %s2213_s20  ;;  %1311 = vrot.lane.b32.xlu1 %v1300_v40, %s2213_s20  ;;  %v599_v31 = vsel %vm562_vm1, %v2730_v36, %v2732_v25  ;;  %v632_v42 = vsel %vm562_vm1, %v2746_v3, %v2761_v62  ;;  %v672_v51 = vadd.f32 %v665_v10, %v638_v56 }
 0x186   : > { %v2936_v21 = vpop.permute.xlu0 %1503  ;;  %v2938_v26 = vpop.permute.xlu1 %1605  ;;  %v605_v5 = vadd.f32 %v598_v35, %v571_v32  ;;  %v641_v6 = vadd.f32 %v2759_v59, %v607_v43  ;;  %v633_v48 = vsel %vm562_vm1, %v2761_v62, %v2759_v59  ;;  %v734_v36 = vsel %vm699_vm2, %v2824_v22, %v2826_v55 }
 0x187   : > { %v666_v3 = vsel %vm562_vm1, %v2778_v33, %v2788_v24  ;;  %v707_v40 = vadd.f32 %v700_v53, %v672_v51  ;;  %v1370_v41 = vmul.f32 %v2918_v19, %v1329_v44  ;;  %v1369_v47 = vmul.f32 %v2921_v49, %v1329_v44 }
 0x188   : > { %v606_v50 = vadd.f32 %v599_v31, %v572_v52  ;;  %v639_v54 = vadd.f32 %v632_v42, %v605_v5  ;;  %v675_v59 = vadd.f32 %v2790_v23, %v641_v6  ;;  %v768_v62 = vsel %vm699_vm2, %v2837_v8, %v2835_v63 }
 0x189   : > { %1377 = vrot.lane.b32.xlu1 %v1368_v28, %s2213_s20  ;;  %1375 = vrot.lane.b32.xlu0 %v1367_v34, %s2213_s20  ;;  %v667_v22 = vsel %vm562_vm1, %v2788_v24, %v2790_v23  ;;  %v701_v33 = vsel %vm699_vm2, %v2799_v12, %v2813_v14  ;;  %v741_v27 = vadd.f32 %v734_v36, %v707_v40  ;;  %v3441_v40 = vld [vmem:[#allocation15_spill] sm:$0xff] }
 0x18a   : > { %v2972_v25 = vpop.permute.xlu0 %1571  ;;  %v2974_v18 = vpop.permute.xlu1 %1674  ;;  %v640_v44 = vadd.f32 %v633_v48, %v606_v50  ;;  %v673_v10 = vadd.f32 %v666_v3, %v639_v54  ;;  %v710_v35 = vadd.f32 %v2811_v13, %v675_v59  ;;  %v802_v8 = vsel %vm699_vm2, %v2843_v38, %v2845_v39  ;;  %v3442_v50 = vld [vmem:[#allocation16_spill] sm:$0xff]  ;;  %v3443_v59 = vld [vmem:[#allocation17_spill] sm:$0xff] }
 0x18b   : > { %v702_v23 = vsel %vm699_vm2, %v2813_v14, %v2811_v13  ;;  %v775_v12 = vadd.f32 %v768_v62, %v741_v27  ;;  %v1438_v28 = vmul.f32 %v2903_v9, %v2795_v30  ;;  %v1437_v34 = vmul.f32 %v2903_v9, %v2770_v1  ;;  %v3445_v27 = vld [vmem:[#allocation23_spill] sm:$0xff] }
 0x18c   : > { %v674_v32 = vadd.f32 %v667_v22, %v640_v44  ;;  %v708_v52 = vadd.f32 %v701_v33, %v673_v10  ;;  %v744_v43 = vadd.f32 %v2833_v57, %v710_v35  ;;  %v837_v38 = vsel %vm836_vm3, %v2853_v46, %v2851_v45  ;;  %v3444_v33 = vld [vmem:[#allocation9_spill] sm:$0xff]  ;;  %v3446_v10 = vld [vmem:[#allocation10_spill] sm:$0xff] }
 0x18d   : > { %1381 = vrot.lane.b32.xlu1 %v1370_v41, %s2213_s20  ;;  %1379 = vrot.lane.b32.xlu0 %v1369_v47, %s2213_s20  ;;  %v735_v53 = vsel %vm699_vm2, %v2826_v55, %v2831_v58  ;;  %v736_v13 = vsel %vm699_vm2, %v2831_v58, %v2833_v57  ;;  %v809_v14 = vadd.f32 %v802_v8, %v775_v12  ;;  %v3447_v12 = vld [vmem:[#allocation19_spill] sm:$0xff] }
 0x18e   : > { %v2997_v56 = vpop.permute.xlu0 %1640  ;;  %v2999_v24 = vpop.permute.xlu1 %1742  ;;  %v709_v31 = vadd.f32 %v702_v23, %v674_v32  ;;  %v778_v42 = vadd.f32 %v2839_v11, %v744_v43  ;;  %v769_v46 = vsel %vm699_vm2, %v2835_v63, %v2841_v60  ;;  %v871_v55 = vsel %vm836_vm3, %v2859_v61, %v2861_v20  ;;  %v3449_v32 = vld [vmem:[#allocation18_spill] sm:$0xff] }
 0x18f   : > { %v770_v58 = vsel %vm699_vm2, %v2841_v60, %v2839_v11  ;;  %v844_v57 = vadd.f32 %v837_v38, %v809_v14  ;;  %v1440_v6 = vmul.f32 %v2944_v37, %v2903_v9  ;;  %v1439_v48 = vmul.f32 %v2941_v2, %v2903_v9  ;;  %v3450_v14 = vld [vmem:[#allocation20_spill] sm:$0xff] }
 0x190   : > { %v742_v63 = vadd.f32 %v735_v53, %v708_v52  ;;  %v743_v36 = vadd.f32 %v736_v13, %v709_v31  ;;  %v812_v3 = vadd.f32 %v2849_v7, %v778_v42  ;;  %v905_v61 = vsel %vm836_vm3, %v2869_v16, %v2867_v17 }
 0x191   : > { %1447 = vrot.lane.b32.xlu1 %v1438_v28, %s2213_s20  ;;  %1445 = vrot.lane.b32.xlu0 %v1437_v34, %s2213_s20  ;;  %v803_v41 = vsel %vm699_vm2, %v2845_v39, %v3441_v40  ;;  %v804_v11 = vsel %vm699_vm2, %v3441_v40, %v2849_v7  ;;  %v878_v60 = vadd.f32 %v871_v55, %v844_v57  ;;  %v3448_v34 = vld [vmem:[#allocation22_spill] sm:$0xff]  ;;  %v3451_v55 = vld [vmem:[#allocation21_spill] sm:$0xff]  ;;  %v3452_v57 = vld [vmem:[#allocation11_spill] sm:$0xff] }
 0x192   : > { %v3027_v51 = vpop.permute.xlu0 %1708  ;;  %v3029_v5 = vpop.permute.xlu1 %1811  ;;  %v776_v9 = vadd.f32 %v769_v46, %v742_v63  ;;  %v777_v47 = vadd.f32 %v770_v58, %v743_v36  ;;  %v847_v54 = vadd.f32 %v3442_v50, %v812_v3  ;;  %v838_v16 = vsel %vm836_vm3, %v2851_v45, %v3443_v59 }
 0x193   : > { %v839_v7 = vsel %vm836_vm3, %v3443_v59, %v3442_v50  ;;  %v912_v22 = vadd.f32 %v905_v61, %v878_v60  ;;  %v1472_v44 = vmul.f32 %v3445_v27, %v3444_v33  ;;  %v1471_v35 = vmul.f32 %v3445_v27, %v3446_v10 }
 0x194   : > { %v810_v8 = vadd.f32 %v803_v41, %v776_v9  ;;  %v811_v23 = vadd.f32 %v804_v11, %v777_v47  ;;  %v881_v28 = vadd.f32 %v3447_v12, %v847_v54  ;;  %v872_v52 = vsel %vm836_vm3, %v2861_v20, %v3449_v32  ;;  %v3454_v47 = vld [vmem:[#allocation13_spill] sm:$0xff]  ;;  %v3455_v54 = vld [vmem:[#allocation12_spill] sm:$0xff] }
 0x195   : > { %1451 = vrot.lane.b32.xlu1 %v1440_v6, %s2213_s20  ;;  %1449 = vrot.lane.b32.xlu0 %v1439_v48, %s2213_s20  ;;  %v873_v43 = vsel %vm836_vm3, %v3449_v32, %v3447_v12  ;;  %v906_v20 = vsel %vm836_vm3, %v2867_v17, %v3451_v55  ;;  %v907_v58 = vsel %vm836_vm3, %v3451_v55, %v3450_v14  ;;  %v3453_v48 = vld [vmem:[#allocation14_spill] sm:$0xff]  ;;  %s2145_s20 = scalar_lea.vmem %s1976_s25, 384 }
 0x196   : > { %v3054_v62 = vpop.permute.xlu0 %1777  ;;  %v934_v39 = vpop.permute.xlu1 %933  ;;  %v845_v53 = vadd.f32 %v838_v16, %v810_v8  ;;  %v846_v13 = vadd.f32 %v839_v7, %v811_v23  ;;  %v915_v31 = vadd.f32 %v3450_v14, %v881_v28  ;;  %v1474_v6 = vmul.f32 %v3445_v27, %v3452_v57  ;;  %p2146_p12 = scmp.ne.s32.totalorder %s1976_s25, %s2145_s20 }
 0x197   : > { %v939_v45 = vsel %vm836_vm3, %v3448_v34, %v934_v39  ;;  %v1473_v63 = vmul.f32 %v3445_v27, %v3453_v48  ;;  %v1507_v50 = vmul.f32 %v2936_v21, %v3454_v47  ;;  %v1506_v59 = vmul.f32 %v2936_v21, %v3455_v54 }
 0x198   : > { %v946_v38 = vadd.f32 %v939_v45, %v912_v22  ;;  %v879_v36 = vadd.f32 %v872_v52, %v845_v53  ;;  %v880_v3 = vadd.f32 %v873_v43, %v846_v13  ;;  %v1508_v8 = vmul.f32 %v2936_v21, %v2886_v15  ;;  %v3456_v52 = vld [vmem:[#allocation24_spill] sm:$0xff]  ;;  %p2147_p13 = pnand %p2146_p12, %p2302_p5 }
 0x199   : > { %1481 = vrot.lane.b32.xlu1 %v1472_v44, %s2214_s16  ;;  %1479 = vrot.lane.b32.xlu0 %v1471_v35, %s2214_s16  ;;  %v1509_v35 = vmul.f32 %v2936_v21, %v2889_v4  ;;  %v1541_v43 = vmul.f32 %v3456_v52, %v2751_v29  ;;  %v1543_v55 = vmul.f32 %v3456_v52, %v2918_v19 }
 0x19a   : > { %v3075_v42 = vpop.permute.xlu0 %1845  ;;  %v938_v46 = vpop.permute.xlu1 %937  ;;  %v913_v40 = vadd.f32 %v906_v20, %v879_v36  ;;  %v914_v41 = vadd.f32 %v907_v58, %v880_v3  ;;  %v1542_v20 = vmul.f32 %v3456_v52, %v2921_v49  ;;  %p2148_p0 = pneg %p2147_p13 }
 0x19b   : > { %v949_v61 = vadd.f32 %v938_v46, %v915_v31 }
 0x19d   : > { %1485 = vrot.lane.b32.xlu1 %v1474_v6, %s2214_s16  ;;  %1483 = vrot.lane.b32.xlu0 %v1473_v63, %s2214_s16 }
 0x19e   : > { %v936_v17 = vpop.permute.xlu0 %935  ;;  %v997_v11 = vpop.permute.xlu1 %996 }
 0x19f   : > { %v940_v60 = vsel %vm836_vm3, %v934_v39, %v936_v17  ;;  %v941_v9 = vsel %vm836_vm3, %v936_v17, %v938_v46 }
 0x1a0   : > { %v947_v16 = vadd.f32 %v940_v60, %v913_v40  ;;  %v948_v7 = vadd.f32 %v941_v9, %v914_v41  ;;  %v1575_v40 = vmul.f32 %v2972_v25, %v2795_v30  ;;  %v1574_v41 = vmul.f32 %v2972_v25, %v2770_v1 }
 0x1a1   : > { %1516 = vrot.lane.b32.xlu1 %v1507_v50, %s2214_s16  ;;  %1514 = vrot.lane.b32.xlu0 %v1506_v59, %s2214_s16 }
 0x1a2   : > { %v995_v22 = vpop.permute.xlu0 %994  ;;  %v1052_v27 = vpop.permute.xlu1 %1051 }
 0x1a3   : > { %v1001_v44 = vsel %vm1000_vm4, %v995_v22, %v997_v11  ;;  %v1007_v39 = vadd.f32 %v995_v22, %v946_v38  ;;  %v1540_v38 = vmul.f32 %v3456_v52, %v2767_v0  ;;  %v1611_v52 = vmul.f32 %v2938_v26, %v3452_v57 }
 0x1a4   : > { %v1008_v23 = vadd.f32 %v1001_v44, %v947_v16  ;;  %v1577_v16 = vmul.f32 %v2972_v25, %v2944_v37 }
 0x1a5   : > { %v1063_v12 = vadd.f32 %v1052_v27, %v1007_v39  ;;  %1520 = vrot.lane.b32.xlu1 %v1509_v35, %s2214_s16  ;;  %1518 = vrot.lane.b32.xlu0 %v1508_v8, %s2214_s16  ;;  %v1609_v8 = vmul.f32 %v2938_v26, %v3444_v33 }
 0x1a6   : > { %v999_v28 = vpop.permute.xlu0 %998  ;;  %v1056_v34 = vpop.permute.xlu1 %1055 }
 0x1a7   : > { %v1002_v45 = vsel %vm1000_vm4, %v997_v11, %v999_v28  ;;  %v1010_v32 = vadd.f32 %v999_v28, %v949_v61 }
 0x1a8   : > { %v1009_v53 = vadd.f32 %v1002_v45, %v948_v7  ;;  %v1576_v7 = vmul.f32 %v2972_v25, %v2941_v2 }
 0x1a9   : > { %v1066_v13 = vadd.f32 %v1056_v34, %v1010_v32  ;;  %1550 = vrot.lane.b32.xlu1 %v1541_v43, %s2214_s16  ;;  %1548 = vrot.lane.b32.xlu0 %v1540_v38, %s2214_s16  ;;  %v1610_v43 = vmul.f32 %v2938_v26, %v3453_v48 }
 0x1aa   : > { %v1054_v21 = vpop.permute.xlu0 %1053  ;;  %v1110_v14 = vpop.permute.xlu1 %1109 }
 0x1ab   : > { %v1057_v31 = vsel %vm1000_vm4, %v1052_v27, %v1054_v21  ;;  %v1058_v46 = vsel %vm1000_vm4, %v1054_v21, %v1056_v34 }
 0x1ac   : > { %v1064_v58 = vadd.f32 %v1057_v31, %v1008_v23  ;;  %v1065_v6 = vadd.f32 %v1058_v46, %v1009_v53  ;;  %v1608_v23 = vmul.f32 %v2938_v26, %v3446_v10  ;;  %v1644_v31 = vmul.f32 %v2997_v56, %v3454_v47 }
 0x1ad   : > { %1554 = vrot.lane.b32.xlu1 %v1543_v55, %s2214_s16  ;;  %1552 = vrot.lane.b32.xlu0 %v1542_v20, %s2214_s16  ;;  %v1643_v46 = vmul.f32 %v2997_v56, %v3455_v54  ;;  %v1646_v20 = vmul.f32 %v2997_v56, %v2889_v4 }
 0x1ae   : > { %v1108_v63 = vpop.permute.xlu0 %1107  ;;  %v1164_v36 = vpop.permute.xlu1 %1163 }
 0x1af   : > { %v1113_v3 = vsel %vm1000_vm4, %v1108_v63, %v1110_v14  ;;  %v1119_v61 = vadd.f32 %v1108_v63, %v1063_v12  ;;  %v1677_v63 = vmul.f32 %v2974_v18, %v2767_v0 }
 0x1b0   : > { %v1120_v17 = vadd.f32 %v1113_v3, %v1064_v58  ;;  %v1645_v58 = vmul.f32 %v2997_v56, %v2886_v15  ;;  %v1679_v56 = vmul.f32 %v2974_v18, %v2921_v49  ;;  %v1711_v3 = vmul.f32 %v3027_v51, %v2770_v1 }
 0x1b1   : > { %v1175_v11 = vadd.f32 %v1164_v36, %v1119_v61  ;;  %1584 = vrot.lane.b32.xlu1 %v1575_v40, %s2214_s16  ;;  %1582 = vrot.lane.b32.xlu0 %v1574_v41, %s2214_s16  ;;  %v1712_v61 = vmul.f32 %v3027_v51, %v2795_v30  ;;  %v1713_v40 = vmul.f32 %v3027_v51, %v2941_v2 }
 0x1b2   : > { %v1112_v60 = vpop.permute.xlu0 %1111  ;;  %v1168_v9 = vpop.permute.xlu1 %1167  ;;  %v1745_v41 = vmul.f32 %v2999_v24, %v3446_v10  ;;  %v1780_v10 = vmul.f32 %v3054_v62, %v3455_v54  ;;  %v1850_v54 = vmul.f32 %v3075_v42, %v2941_v2 }
 0x1b3   : > { %v1114_v50 = vsel %vm1000_vm4, %v1110_v14, %v1112_v60  ;;  %v1122_v59 = vadd.f32 %v1112_v60, %v1066_v13 }
 0x1b4   : > { %v1121_v22 = vadd.f32 %v1114_v50, %v1065_v6  ;;  %v1678_v6 = vmul.f32 %v2974_v18, %v2751_v29 }
 0x1b5   : > { %v1178_v27 = vadd.f32 %v1168_v9, %v1122_v59  ;;  %1588 = vrot.lane.b32.xlu1 %v1577_v16, %s2214_s16  ;;  %1586 = vrot.lane.b32.xlu0 %v1576_v7, %s2214_s16  ;;  %s2218_s16 = smov [#allocation3]  }
 0x1b6   : > { %v1166_v44 = vpop.permute.xlu0 %1165  ;;  %v1237_v25 = vpop.permute.xlu1 %1236 }
 0x1b7   : > { %v1169_v39 = vsel %vm1000_vm4, %v1164_v36, %v1166_v44  ;;  %v1170_v35 = vsel %vm1000_vm4, %v1166_v44, %v1168_v9  ;;  %v1680_v36 = vmul.f32 %v2974_v18, %v2918_v19  ;;  %v1714_v18 = vmul.f32 %v3027_v51, %v2944_v37 }
 0x1b8   : > { %v1176_v12 = vadd.f32 %v1169_v39, %v1120_v17  ;;  %v1177_v28 = vadd.f32 %v1170_v35, %v1121_v22  ;;  %v1746_v17 = vmul.f32 %v2999_v24, %v3444_v33  ;;  %v1748_v51 = vmul.f32 %v2999_v24, %v3452_v57  ;;  %v3457_v22 = vld [vmem:[#allocation6_spill] sm:$0xff]  ;;  %v3458_v35 = vld [vmem:[#allocation7_spill] sm:$0xff] }
 0x1b9   : > { %1618 = vrot.lane.b32.xlu1 %v1609_v8, %s2215_s17  ;;  %1616 = vrot.lane.b32.xlu0 %v1608_v23, %s2215_s17  ;;  %v1781_v33 = vmul.f32 %v3054_v62, %v3454_v47  ;;  %v1814_v57 = vmul.f32 %v3029_v5, %v2767_v0  ;;  %v1815_v47 = vmul.f32 %v3029_v5, %v2751_v29  ;;  %v3459_v8 = vld [vmem:[#allocation8_spill] sm:$0xff] }
 0x1ba   : > { %v1235_v34 = vpop.permute.xlu0 %1234  ;;  %v1241_v53 = vpop.permute.xlu1 %1240  ;;  %v1817_v0 = vmul.f32 %v3029_v5, %v2918_v19  ;;  %v1848_v29 = vmul.f32 %v3075_v42, %v2770_v1  ;;  %v1851_v1 = vmul.f32 %v3075_v42, %v2944_v37 }
 0x1bb   : > { %v1243_v45 = vsel %vm1242_vm5, %v1235_v34, %v1237_v25  ;;  %v3142_v32 = vadd.f32 %v1235_v34, %v1175_v11  ;;  %v1747_v11 = vmul.f32 %v2999_v24, %v3453_v48  ;;  %v1782_v48 = vmul.f32 %v3054_v62, %v2886_v15  ;;  %v1875_v15 = vld [vmem:[%s3390_s3] sm:$0xff] }
 0x1bc   : > { %v3148_v38 = vadd.f32 %v1243_v45, %v1176_v12  ;;  %v1783_v24 = vmul.f32 %v3054_v62, %v2889_v4  ;;  %v1816_v4 = vmul.f32 %v3029_v5, %v2921_v49  ;;  %v1849_v62 = vmul.f32 %v3075_v42, %v2795_v30 }
 0x1bd   : > { %1622 = vrot.lane.b32.xlu1 %v1611_v52, %s2215_s17  ;;  %1620 = vrot.lane.b32.xlu0 %v1610_v43, %s2215_s17 }
 0x1be   : > { %v1239_v13 = vpop.permute.xlu0 %1238 }
 0x1bf   : > { %v1244_v21 = vsel %vm1242_vm5, %v1237_v25, %v1239_v13  ;;  %v1245_v14 = vsel %vm1242_vm5, %v1239_v13, %v1241_v53 }
 0x1c0   : > { %v3158_v55 = vadd.f32 %v1244_v21, %v1177_v28  ;;  %v3160_v26 = vadd.f32 %v1245_v14, %v1178_v27 }
 0x1c1   : > { %1653 = vrot.lane.b32.xlu1 %v1644_v31, %s2215_s17  ;;  %1651 = vrot.lane.b32.xlu0 %v1643_v46, %s2215_s17 }
 0x1c5   : > { %1657 = vrot.lane.b32.xlu1 %v1646_v20, %s2215_s17  ;;  %1655 = vrot.lane.b32.xlu0 %v1645_v58, %s2215_s17 }
 0x1c9   : > { %1687 = vrot.lane.b32.xlu1 %v1678_v6, %s2215_s17  ;;  %1685 = vrot.lane.b32.xlu0 %v1677_v63, %s2215_s17 }
 0x1cd   : > { %1691 = vrot.lane.b32.xlu1 %v1680_v36, %s2215_s17  ;;  %1689 = vrot.lane.b32.xlu0 %v1679_v56, %s2215_s17 }
 0x1d1   : > { %1721 = vrot.lane.b32.xlu1 %v1712_v61, %s2215_s17  ;;  %1719 = vrot.lane.b32.xlu0 %v1711_v3, %s2215_s17 }
 0x1d5   : > { %1725 = vrot.lane.b32.xlu1 %v1714_v18, %s2215_s17  ;;  %1723 = vrot.lane.b32.xlu0 %v1713_v40, %s2215_s17  ;;  %s2149_s17 = sshll.u32 %s2218_s16, 4  ;;  %s2150_s17 = int_to_ptr.vmem [resolvable:$false] %s2149_s17 }
 0x1d6   : > { %p2152_p1 = scmp.lt.s32.totalorder %s1976_s25, %s2150_s17 }
 0x1d9   : > { %1755 = vrot.lane.b32.xlu1 %v1746_v17, %s2216_s18  ;;  %1753 = vrot.lane.b32.xlu0 %v1745_v41, %s2216_s18 }
 0x1dd   : > { %1759 = vrot.lane.b32.xlu1 %v1748_v51, %s2216_s18  ;;  %1757 = vrot.lane.b32.xlu0 %v1747_v11, %s2216_s18 }
 0x1e1   : > { %1790 = vrot.lane.b32.xlu1 %v1781_v33, %s2216_s18  ;;  %1788 = vrot.lane.b32.xlu0 %v1780_v10, %s2216_s18 }
 0x1e5   : > { %1794 = vrot.lane.b32.xlu1 %v1783_v24, %s2216_s18  ;;  %1792 = vrot.lane.b32.xlu0 %v1782_v48, %s2216_s18 }
 0x1e9   : > { %1824 = vrot.lane.b32.xlu1 %v1815_v47, %s2216_s18  ;;  %1822 = vrot.lane.b32.xlu0 %v1814_v57, %s2216_s18 }
 0x1ed   : > { %1878 = vperm.xlu1 %2144, %v1875_v15   ;;  %1826 = vrot.lane.b32.xlu0 %v1816_v4, %s2216_s18 }
 0x1f1   : > { %1856 = vrot.lane.b32.xlu1 %v1848_v29, %s2216_s18  ;;  %1828 = vrot.lane.b32.xlu0 %v1817_v0, %s2216_s18 }
 0x1f3   : > { %v1306_v49 = vpop.permute.xlu0 %1305  ;;  %v1308_v60 = vpop.permute.xlu1 %1307 }
 0x1f4   : > { %v1320_v9 = vadd.f32 %v1306_v49, %v3142_v32  ;;  %v1313_v50 = vsel %vm1242_vm5, %v1306_v49, %v1308_v60 }
 0x1f5   : > { %v1321_v19 = vadd.f32 %v1313_v50, %v3148_v38  ;;  %1860 = vrot.lane.b32.xlu1 %v1850_v54, %s2216_s18  ;;  %1858 = vrot.lane.b32.xlu0 %v1849_v62, %s2216_s18 }
 0x1f7   : > { %v1310_v5 = vpop.permute.xlu0 %1309  ;;  %v1312_v30 = vpop.permute.xlu1 %1311 }
 0x1f8   : > { %v1314_v59 = vsel %vm1242_vm5, %v1308_v60, %v1310_v5  ;;  %v1315_v2 = vsel %vm1242_vm5, %v1310_v5, %v1312_v30 }
 0x1f9   : > { %v1322_v16 = vadd.f32 %v1314_v59, %v3158_v55  ;;  %v1323_v7 = vadd.f32 %v1315_v2, %v3160_v26  ;;  %1862 = vrot.lane.b32.xlu0 %v1851_v1, %s2216_s18  ;;  %1885 = vrot.lane.b32.xlu1 %v3457_v22, %s2212_s11  ;;  %s2151_s18 = scalar_lea.vmem %s2150_s17, 768 }
 0x1fa   : > { %p2153_p2 = scmp.lt.s32.totalorder %s2151_s18, %s2145_s20 }
 0x1fb   : > { %v1376_v27 = vpop.permute.xlu0 %1375  ;;  %v1378_v44 = vpop.permute.xlu1 %1377 }
 0x1fc   : > { %v1390_v39 = vadd.f32 %v1376_v27, %v1320_v9  ;;  %v1383_v37 = vsel %vm1242_vm5, %v1376_v27, %v1378_v44  ;;  %p2154_p3 = por %p2153_p2, %p2152_p1 }
 0x1fd   : > { %v1391_v42 = vadd.f32 %v1383_v37, %v1321_v19  ;;  %1887 = vrot.lane.b32.xlu0 %v3458_v35, %s2212_s11  ;;  %1889 = vrot.lane.b32.xlu1 %v3459_v8, %s2212_s11  ;;  %s1961_s11 = scalar_lea.sflag [#allocation4], %s287_s15 }
 0x1fe   : > { %p2155_p4 = pnand %p2154_p3, %p2148_p0 }
 0x1ff   : > { %v1380_v23 = vpop.permute.xlu0 %1379  ;;  %v1382_v12 = vpop.permute.xlu1 %1381 }
 0x200   : > { %v1384_v28 = vsel %vm1242_vm5, %v1378_v44, %v1380_v23  ;;  %v1385_v25 = vsel %vm1242_vm5, %v1380_v23, %v1382_v12 }
 0x201   : > { %v1392_v34 = vadd.f32 %v1384_v28, %v1322_v16  ;;  %v1393_v45 = vadd.f32 %v1385_v25, %v1323_v7 }
 0x203   : > { %v1446_v32 = vpop.permute.xlu0 %1445  ;;  %v1448_v52 = vpop.permute.xlu1 %1447 }
 0x204   : > { %v1460_v43 = vadd.f32 %v1446_v32, %v1390_v39  ;;  %v1453_v38 = vsel %vm1242_vm5, %v1446_v32, %v1448_v52 }
 0x205   : > { %v1461_v53 = vadd.f32 %v1453_v38, %v1391_v42 }
 0x207   : > { %v1450_v13 = vpop.permute.xlu0 %1449  ;;  %v1452_v21 = vpop.permute.xlu1 %1451 }
 0x208   : > { %v1454_v14 = vsel %vm1242_vm5, %v1448_v52, %v1450_v13  ;;  %v1455_v31 = vsel %vm1242_vm5, %v1450_v13, %v1452_v21 }
 0x209   : > { %v1462_v46 = vadd.f32 %v1454_v14, %v1392_v34  ;;  %v1463_v55 = vadd.f32 %v1455_v31, %v1393_v45 }
 0x20b   : > { %v1480_v26 = vpop.permute.xlu0 %1479  ;;  %v1482_v20 = vpop.permute.xlu1 %1481 }
 0x20c   : > { %v1495_v58 = vadd.f32 %v1480_v26, %v1460_v43  ;;  %v1488_v6 = vsel %vm1487_vm6, %v1480_v26, %v1482_v20 }
 0x20d   : > { %v1496_v63 = vadd.f32 %v1488_v6, %v1461_v53 }
 0x20f   : > { %v1484_v36 = vpop.permute.xlu0 %1483  ;;  %v1486_v56 = vpop.permute.xlu1 %1485 }
 0x210   : > { %v1489_v3 = vsel %vm1487_vm6, %v1482_v20, %v1484_v36  ;;  %v1490_v61 = vsel %vm1487_vm6, %v1484_v36, %v1486_v56 }
 0x211   : > { %v1497_v40 = vadd.f32 %v1489_v3, %v1462_v46  ;;  %v1498_v18 = vadd.f32 %v1490_v61, %v1463_v55 }
 0x213   : > { %v1515_v41 = vpop.permute.xlu0 %1514  ;;  %v1517_v17 = vpop.permute.xlu1 %1516 }
 0x214   : > { %v1529_v11 = vadd.f32 %v1515_v41, %v1495_v58  ;;  %v1522_v51 = vsel %vm1487_vm6, %v1515_v41, %v1517_v17 }
 0x215   : > { %v1530_v10 = vadd.f32 %v1522_v51, %v1496_v63 }
 0x217   : > { %v1519_v33 = vpop.permute.xlu0 %1518  ;;  %v1521_v48 = vpop.permute.xlu1 %1520 }
 0x218   : > { %v1523_v24 = vsel %vm1487_vm6, %v1517_v17, %v1519_v33  ;;  %v1524_v57 = vsel %vm1487_vm6, %v1519_v33, %v1521_v48 }
 0x219   : > { %v1531_v47 = vadd.f32 %v1523_v24, %v1497_v40  ;;  %v1532_v15 = vadd.f32 %v1524_v57, %v1498_v18 }
 0x21b   : > { %v1549_v4 = vpop.permute.xlu0 %1548  ;;  %v1551_v0 = vpop.permute.xlu1 %1550 }
 0x21c   : > { %v1556_v43 = vsel %vm1487_vm6, %v1549_v4, %v1551_v0  ;;  %v1563_v53 = vadd.f32 %v1549_v4, %v1529_v11 }
 0x21d   : > { %v1564_v21 = vadd.f32 %v1556_v43, %v1530_v10 }
 0x21f   : > { %v1553_v29 = vpop.permute.xlu0 %1552  ;;  %v1555_v62 = vpop.permute.xlu1 %1554 }
 0x220   : > { %v1558_v54 = vsel %vm1487_vm6, %v1553_v29, %v1555_v62  ;;  %v1557_v31 = vsel %vm1487_vm6, %v1551_v0, %v1553_v29 }
 0x221   : > { %v3271_v49 = vadd.f32 %v1558_v54, %v1532_v15  ;;  %v1565_v36 = vadd.f32 %v1557_v31, %v1531_v47 }
 0x223   : > { %v1583_v60 = vpop.permute.xlu0 %1582  ;;  %v1585_v9 = vpop.permute.xlu1 %1584 }
 0x224   : > { %v1590_v13 = vsel %vm1487_vm6, %v1583_v60, %v1585_v9  ;;  %v1597_v46 = vadd.f32 %v1583_v60, %v1563_v53 }
 0x225   : > { %v1598_v20 = vadd.f32 %v1590_v13, %v1564_v21 }
 0x227   : > { %v1587_v50 = vpop.permute.xlu0 %1586  ;;  %v1589_v19 = vpop.permute.xlu1 %1588 }
 0x228   : > { %v1591_v58 = vsel %vm1487_vm6, %v1585_v9, %v1587_v50  ;;  %v1592_v51 = vsel %vm1487_vm6, %v1587_v50, %v1589_v19 }
 0x229   : > { %v1599_v41 = vadd.f32 %v1591_v58, %v1565_v36  ;;  %v1600_v29 = vadd.f32 %v1592_v51, %v3271_v49 }
 0x22b   : > { %v1617_v1 = vpop.permute.xlu0 %1616  ;;  %v1619_v5 = vpop.permute.xlu1 %1618 }
 0x22c   : > { %v1625_v55 = vsel %vm1624_vm7, %v1617_v1, %v1619_v5  ;;  %v1632_v6 = vadd.f32 %v1617_v1, %v1597_v46 }
 0x22d   : > { %v1633_v56 = vadd.f32 %v1625_v55, %v1598_v20 }
 0x22f   : > { %v1621_v30 = vpop.permute.xlu0 %1620  ;;  %v1623_v59 = vpop.permute.xlu1 %1622 }
 0x230   : > { %v1626_v3 = vsel %vm1624_vm7, %v1619_v5, %v1621_v30  ;;  %v1627_v47 = vsel %vm1624_vm7, %v1621_v30, %v1623_v59 }
 0x231   : > { %v1634_v24 = vadd.f32 %v1626_v3, %v1599_v41  ;;  %v1635_v30 = vadd.f32 %v1627_v47, %v1600_v29 }
 0x233   : > { %v1652_v2 = vpop.permute.xlu0 %1651  ;;  %v1654_v16 = vpop.permute.xlu1 %1653 }
 0x234   : > { %v1659_v63 = vsel %vm1624_vm7, %v1652_v2, %v1654_v16  ;;  %v1666_v61 = vadd.f32 %v1652_v2, %v1632_v6 }
 0x235   : > { %v1667_v17 = vadd.f32 %v1659_v63, %v1633_v56 }
 0x237   : > { %v1656_v7 = vpop.permute.xlu0 %1655  ;;  %v1658_v22 = vpop.permute.xlu1 %1657 }
 0x238   : > { %v1660_v10 = vsel %vm1624_vm7, %v1654_v16, %v1656_v7  ;;  %v1661_v50 = vsel %vm1624_vm7, %v1656_v7, %v1658_v22 }
 0x239   : > { %v1668_v62 = vadd.f32 %v1660_v10, %v1634_v24 }
 0x23b   : > { %v1686_v27 = vpop.permute.xlu0 %1685  ;;  %v1688_v44 = vpop.permute.xlu1 %1687 }
 0x23c   : > { %v1693_v40 = vsel %vm1624_vm7, %v1686_v27, %v1688_v44  ;;  %v1700_v33 = vadd.f32 %v1686_v27, %v1666_v61 }
 0x23d   : > { %v1701_v57 = vadd.f32 %v1693_v40, %v1667_v17 }
 0x23f   : > { %v1690_v39 = vpop.permute.xlu0 %1689  ;;  %v1692_v37 = vpop.permute.xlu1 %1691 }
 0x240   : > { %v1694_v15 = vsel %vm1624_vm7, %v1688_v44, %v1690_v39  ;;  %v1695_v16 = vsel %vm1624_vm7, %v1690_v39, %v1692_v37 }
 0x241   : > { %v1702_v59 = vadd.f32 %v1694_v15, %v1668_v62 }
 0x243   : > { %v1720_v42 = vpop.permute.xlu0 %1719  ;;  %v1722_v35 = vpop.permute.xlu1 %1721 }
 0x244   : > { %v1727_v48 = vsel %vm1624_vm7, %v1720_v42, %v1722_v35  ;;  %v1734_v4 = vadd.f32 %v1720_v42, %v1700_v33  ;;  %v1669_v42 = vadd.f32 %v1661_v50, %v1635_v30 }
 0x245   : > { %v1735_v54 = vadd.f32 %v1727_v48, %v1701_v57 }
 0x246   : > { %v1703_v37 = vadd.f32 %v1695_v16, %v1669_v42 }
 0x247   : > { %v3273_v8 = vpop.permute.xlu0 %1723  ;;  %v3275_v23 = vpop.permute.xlu1 %1725 }
 0x248   : > { %v1728_v19 = vsel %vm1624_vm7, %v1722_v35, %v3273_v8  ;;  %v1729_v35 = vsel %vm1624_vm7, %v3273_v8, %v3275_v23 }
 0x249   : > { %v1736_v43 = vadd.f32 %v1728_v19, %v1702_v59  ;;  %v1737_v55 = vadd.f32 %v1729_v35, %v1703_v37 }
 0x24b   : > { %v1754_v12 = vpop.permute.xlu0 %1753  ;;  %v1756_v28 = vpop.permute.xlu1 %1755 }
 0x24c   : > { %v1762_v0 = vsel %vm1761_vm8, %v1754_v12, %v1756_v28  ;;  %v1769_v1 = vadd.f32 %v1754_v12, %v1734_v4 }
 0x24d   : > { %v1770_v2 = vadd.f32 %v1762_v0, %v1735_v54 }
 0x24f   : > { %v3277_v25 = vpop.permute.xlu0 %1757  ;;  %v3279_v34 = vpop.permute.xlu1 %1759 }
 0x250   : > { %v1763_v49 = vsel %vm1761_vm8, %v1756_v28, %v3277_v25  ;;  %v1764_v21 = vsel %vm1761_vm8, %v3277_v25, %v3279_v34 }
 0x251   : > { %v1771_v13 = vadd.f32 %v1763_v49, %v1736_v43  ;;  %v1772_v58 = vadd.f32 %v1764_v21, %v1737_v55 }
 0x253   : > { %v1789_v45 = vpop.permute.xlu0 %1788  ;;  %v1791_v52 = vpop.permute.xlu1 %1790 }
 0x254   : > { %v1796_v5 = vsel %vm1761_vm8, %v1789_v45, %v1791_v52  ;;  %v1803_v27 = vadd.f32 %v1789_v45, %v1769_v1 }
 0x255   : > { %v1804_v7 = vadd.f32 %v1796_v5, %v1770_v2 }
 0x257   : > { %v3281_v32 = vpop.permute.xlu0 %1792  ;;  %v3285_v14 = vpop.permute.xlu1 %1794 }
 0x258   : > { %v1797_v12 = vsel %vm1761_vm8, %v1791_v52, %v3281_v32  ;;  %v1798_v52 = vsel %vm1761_vm8, %v3281_v32, %v3285_v14 }
 0x259   : > { %v1805_v8 = vadd.f32 %v1797_v12, %v1771_v13  ;;  %v1806_v36 = vadd.f32 %v1798_v52, %v1772_v58 }
 0x25b   : > { %v1823_v38 = vpop.permute.xlu0 %1822  ;;  %v1825_v11 = vpop.permute.xlu1 %1824 }
 0x25c   : > { %v1830_v44 = vsel %vm1761_vm8, %v1823_v38, %v1825_v11  ;;  %v1837_v53 = vadd.f32 %v1823_v38, %v1803_v27 }
 0x25d   : > { %v1838_v28 = vadd.f32 %v1830_v44, %v1804_v7 }
 0x25f   : > { %v3289_v26 = vpop.permute.xlu0 %1826 }
 0x260   : > { %v1831_v31 = vsel %vm1761_vm8, %v1825_v11, %v3289_v26 }
 0x261   : > { %v1839_v6 = vadd.f32 %v1831_v31, %v1805_v8 }
 0x263   : > { %v1829_v18 = vpop.permute.xlu0 %1828 }
 0x264   : > { %v1832_v25 = vsel %vm1761_vm8, %v3289_v26, %v1829_v18 }
 0x265   : > { %v1840_v11 = vadd.f32 %v1832_v25, %v1806_v36 }
 0x267   : > { %v1859_v60 = vpop.permute.xlu0 %1858 }
 0x268   : > { %v1879_v9 = vpop.permute.xlu1 %1878 }
 0x26b   : > { %v1863_v45 = vpop.permute.xlu0 %1862 }
 0x26c   : > { %v1857_v22 = vpop.permute.xlu1 %1856 }
 0x26d   : > { %v1864_v39 = vsel %vm1761_vm8, %v1857_v22, %v1859_v60  ;;  %v1871_v46 = vadd.f32 %v1857_v22, %v1837_v53 }
 0x26e   : > { %v1872_v23 = vadd.f32 %v1864_v39, %v1838_v28 }
 0x26f   : > { %v1888_v63 = vpop.permute.xlu0 %1887  ;;  %v1881_v34 = vadd.f32 %v1879_v9, %v1871_v46 }
 0x270   : > { %v1861_v20 = vpop.permute.xlu1 %1860  ;;  %v1882_v3 = vadd.f32 %v1879_v9, %v1872_v23 }
 0x271   : > { %v1865_v38 = vsel %vm1761_vm8, %v1859_v60, %v1861_v20  ;;  %v1866_v40 = vsel %vm1761_vm8, %v1861_v20, %v1863_v45 }
 0x272   : > { %v1873_v56 = vadd.f32 %v1865_v38, %v1839_v6  ;;  %v1874_v14 = vadd.f32 %v1866_v40, %v1840_v11 }
 0x274   : > { %v1886_v61 = vpop.permute.xlu1 %1885  ;;  %v1883_v51 = vadd.f32 %v1879_v9, %v1873_v56  ;;  %v1884_v48 = vadd.f32 %v1879_v9, %v1874_v14 }
 0x275   : > { %v1891_v41 = vsel %vm1000_vm4, %v1886_v61, %v1888_v63  ;;  %v1897_v17 = vmul.f32 %v1886_v61, %v1881_v34 }
 0x276   : > { %v1898_v32 = vmul.f32 %v1891_v41, %v1882_v3 }
 0x277   : > { %1905 = vrot.lane.b32.xlu0 %v1897_v17, %s2217_s23  ;;  %v1932_v18 = vmul.f32 %v1897_v17, %v1897_v17 }
 0x278   : > { %1907 = vrot.lane.b32.xlu1 %v1898_v32, %s2217_s23  ;;  %v1890_v10 = vpop.permute.xlu1 %1889  ;;  %v1933_v24 = vmul.f32 %v1898_v32, %v1898_v32 }
 0x279   : > { %v1892_v26 = vsel %vm1000_vm4, %v1888_v63, %v1890_v10  ;;  %v1900_v57 = vmul.f32 %v1890_v10, %v1884_v48 }
 0x27a   : > { %v1899_v33 = vmul.f32 %v1892_v26, %v1883_v51 }
 0x27b   : > { %v1935_v15 = vmul.f32 %v1900_v57, %v1900_v57 }
 0x27c   : > { %1909 = vrot.lane.b32.xlu0 %v1899_v33, %s2217_s23  ;;  %1940 = vrot.lane.b32.xlu1 %v1932_v18, %s2217_s23  ;;  %v1934_v47 = vmul.f32 %v1899_v33, %v1899_v33 }
 0x280   : > { %1942 = vrot.lane.b32.xlu0 %v1933_v24, %s2217_s23  ;;  %1944 = vrot.lane.b32.xlu1 %v1934_v47, %s2217_s23 }
 0x284   : > { %1911 = vrot.lane.b32.xlu0 %v1900_v57, %s2217_s23  ;;  %1946 = vrot.lane.b32.xlu1 %v1935_v15, %s2217_s23 }
 0x2e9   : > { %v1906_v4 = vpop.permute.xlu0 %1905 }
 0x2ea   : > { %v1908_v0 = vpop.permute.xlu1 %1907 }
 0x2eb   : > { %v1914_v29 = vsel %vm1913_vm9, %v1906_v4, %v1908_v0 }
 0x2ec   : > { %1920 = vst [vmem:[%s2322_s22] sm:$0xff] %v1914_v29 }
 0x2ee   : > { %v1910_v62 = vpop.permute.xlu0 %1909  ;;  %v1941_v54 = vpop.permute.xlu1 %1940 }
 0x2ef   : > { %v1915_v60 = vsel %vm1913_vm9, %v1908_v0, %v1910_v62 }
 0x2f0   : > { %1921 = vst [vmem:[%s2322_s22 + $0x8] sm:$0xff] %v1915_v60  ;;  %v1924_v5 = vadd.f32 %v1915_v60, %v1914_v29 }
 0x2f2   : > { %v1943_v9 = vpop.permute.xlu0 %1942  ;;  %v1945_v50 = vpop.permute.xlu1 %1944 }
 0x2f3   : > { %v1948_v19 = vsel %vm1913_vm9, %v1941_v54, %v1943_v9  ;;  %v1949_v1 = vsel %vm1913_vm9, %v1943_v9, %v1945_v50 }
 0x2f4   : > { %v1954_v30 = vadd.f32 %v1949_v1, %v1948_v19 }
 0x2f6   : > { %v1912_v59 = vpop.permute.xlu0 %1911  ;;  %v1947_v2 = vpop.permute.xlu1 %1946 }
 0x2f7   : > { %v1916_v16 = vsel %vm1913_vm9, %v1910_v62, %v1912_v59  ;;  %v1950_v49 = vsel %vm1913_vm9, %v1945_v50, %v1947_v2 }
 0x2f8   : > { %1922 = vst [vmem:[%s2322_s22 + $0x10] sm:$0xff] %v1916_v16  ;;  %v1925_v27 = vadd.f32 %v1924_v5, %v1916_v16  ;;  %v1955_v44 = vadd.f32 %v1954_v30, %v1950_v49 }
 0x2fa   : > { %1926 = vadd.xlane.f32.xlu0 %v1925_v27  ;;  %1956 = vadd.xlane.f32.xlu1 %v1955_v44 }
 0x2fb   : > { %2158 = shalt.err (!%p2155_p4)
}
 0x2fc   : > { %s2159_s5 = scalar_lea.hbm %s1973_s10, 384  ;;  %s2163_s21 = scalar_lea.hbm %s3393_s6, 768 }
 0x2fd   : > { %p2160_p7 = scmp.ne.s32.totalorder %s1973_s10, %s2159_s5  ;;  %p2164_p10 = scmp.lt.s32.totalorder %s1973_s10, %s3393_s6 }
 0x2fe   : > { %p2165_p11 = scmp.lt.s32.totalorder %s2163_s21, %s2159_s5 }
 0x2ff   : > { %p2161_p8 = pnand %p2160_p7, %p2302_p5 }
 0x300   : > { %p2166_p12 = por %p2165_p11, %p2164_p10 }
 0x301   : > { %p2162_p9 = pneg %p2161_p8 }
 0x303   : > { %p2167_p13 = pnand %p2166_p12, %p2162_p9 }
 0x305   : > { %2170 = shalt.err (!%p2167_p13)
}
 0x306   : > { %2093 = dma.vmem_to_hbm [thread:$0]  (%p2302_p5), %s1976_s25, 384, %s1973_s10, %s1961_s11   ;;  %v1923_v42 = vld [vmem:[%s3394_s7] sm:$0xff]  ;;  %vm1929_vm10 = vcmask 7168  }
 0x307   : > { %v1931_v43 = vld [vmem:[%s3395_s8] sm:$0xff] }
 0x383   : > { %v1927_v7 = vpop.xlane.xlu0 %1926  ;;  %v1957_v22 = vpop.xlane.xlu1 %1956 }
 0x384   : > { %v1928_v35 = vadd.f32 %v1927_v7, %v1923_v42  ;;  %v1958_v12 = vadd.f32 %v1957_v22, %v1931_v43 }
 0x386   : > { %1930 = vst.msk [vmem:[%s3394_s7] sm:$0xff] %vm1929_vm10, %v1928_v35  ;;  %1959 = vst.msk [vmem:[%s3395_s8] sm:$0xff] %vm1929_vm10, %v1958_v12 }
 0x387 PF: > { %p2099_p5 = scmp.ge.s32.totalorder %s2205_s4, 2  ;;  %s1999_s25 = sand.u32 1, %s2193_s27  }
 0x388   : > { %s2000_s10 = scalar_lea.sflag [#allocation4], %s1999_s25 }
 0x389   : > { %p2096_p0 = pnand %p2099_p5, %p2306_p6 }
 0x38b   : > { %p2097_p1 = pneg %p2096_p0 }
 0x38d   : > { %2188 = dma.done.wait (%p2097_p1), %s2000_s10, 384  }
 0x38e   : > { %2190 = vsyncadd (%p2097_p1), %s2000_s10, 4294966912  ;;  %p19_p2 = scmp.ge.s32.totalorder %s2289_s9, 4   ;;  %s3460_s27 = smov %s2197_s28 }
 0x38f   : > { %s3461_s28 = smov %s2201_s29  ;;  %s3462_s29 = smov %s2300_s12 }
 0x390   : > { %s3463_s4 = smov %s2289_s9  ;;  %21 = sbr.rel (!%p19_p2) target bundleno = 3 (0x3), region = 134 }
 0x395   :  { %2005 = vsyncpa [#allocation4], 1 }
 0x396   :  { %2007 = vsyncpa [#allocation4 + $0x1], 1 }

</bundles_post_ra>
